<compile_context>
chip_gen: v7x
topology: tpu7x:2x2x1
jax: 0.10.0
libtpu: 0.0.40
codegen_flags: <defaults>
</compile_context>

<pallas_src>
import jax
import jax.numpy as jnp
from jax.experimental import pallas as pl
from jax.experimental.pallas import tpu as pltpu


def _softplus(x):
    # numerically stable softplus (matches torch.nn.functional.softplus, beta=1)
    return jnp.maximum(x, 0.0) + jnp.log(1.0 + jnp.exp(-jnp.abs(x)))


def _round_up(x, m):
    return (x + m - 1) // m * m


def _make_kernel(H, W, HWp):
    def kernel(w1_ref, w2_ref, w3_ref, x_ref, out_ref):
        # x_ref: (6, TB, HWp) VMEM, out_ref: (3, TB, HWp) VMEM, w*_ref: f32 SMEM.
        TB = x_ref.shape[1]
        f32 = jnp.float32
        shape = (TB, HWp)

        # ---- boundary masks for the 3x3 conv (built once, reused 27x) ----
        flat = jax.lax.broadcasted_iota(jnp.int32, shape, 1)   # flattened h*W+w
        colj = flat % W
        row_mask = (flat >= W, None, flat < (H - 1) * W)       # kh = 0, 1, 2
        col_mask = (colj >= 1, None, colj <= W - 2)            # kw = 0, 1, 2

        # ---- conv1: 1x1, 6 -> 3, no bias ----
        x1 = []
        for o in range(3):
            acc = w1_ref[o * 6] * x_ref[0].astype(f32)
            for c in range(1, 6):
                acc = acc + w1_ref[o * 6 + c] * x_ref[c].astype(f32)
            x1.append(acc)

        # ---- conv2: 3x3, 3 -> 3, padding=1, no bias ----
        # Taps are circular rolls on the flattened spatial axis; boundary masks
        # zero the wrapped / cross-row elements (equivalent to zero padding).
        acc2 = [jnp.zeros(shape, f32) for _ in range(3)]
        for c in range(3):
            for kh in range(3):
                dh = kh - 1
                if dh == 0:
                    rowsh = x1[c]
                else:
                    r = pltpu.roll(x1[c], shift=(-dh * W) % HWp, axis=1)
                    rowsh = jnp.where(row_mask[kh], r, 0.0)
                for kw in range(3):
                    dw = kw - 1
                    if dw == 0:
                        tap = rowsh
                    else:
                        t = pltpu.roll(rowsh, shift=(-dw) % HWp, axis=1)
                        tap = jnp.where(col_mask[kw], t, 0.0)
                    base = (c * 3 + kh) * 3 + kw        # OIHW flatten: o*27+base
                    for o in range(3):
                        acc2[o] = acc2[o] + w2_ref[o * 27 + base] * tap

        # ---- Mish: y * tanh(softplus(y)), fused to one exp + one divide ----
        # tanh(softplus(y)) = ((1+e^y)^2 - 1) / ((1+e^y)^2 + 1).  Clamping y at
        # 20 guards e^y overflow; beyond that the exact value rounds to 1.0 in f32.
        x2 = []
        for o in range(3):
            y = acc2[o]
            e = jnp.exp(jnp.minimum(y, 20.0))
            q = (1.0 + e) * (1.0 + e)
            x2.append(y * ((q - 1.0) / (q + 1.0)))

        # ---- score = tanh(cat([x1, x2])) ; conv3: 1x1, 6 -> 3 ; * x1 ----
        t_all = [jnp.tanh(v) for v in x1] + [jnp.tanh(v) for v in x2]
        for o in range(3):
            acc = w3_ref[o * 6] * t_all[0]
            for c in range(1, 6):
                acc = acc + w3_ref[o * 6 + c] * t_all[c]
            out_ref[o] = (acc * x1[o]).astype(out_ref.dtype)

    return kernel


def tconv_block_fast(x, w1, w2, w3):
    """x: (N, 6, H, W) f32; w1: (3,6,1,1); w2: (3,3,3,3); w3: (3,6,1,1)."""
    N, C, H, W = x.shape
    assert C == 6
    HW = H * W
    HWp = _round_up(HW, 128)

    # Batch block: multiple of 8 sublanes, as large as divides cleanly (amortizes
    # the ~0.35 us per-grid-step overhead and keeps DMA tiles reasonably big).
    n8 = _round_up(N, 8)
    TB = 8
    for cand in (64, 32, 16):
        if n8 % cand == 0:
            TB = cand
            break
    Np = _round_up(n8, TB)

    # Lane-dense layout plumbing: (N,6,H,W) -> (6, Np, HWp), zero-padded.
    xf = x.reshape(N, C, HW).astype(jnp.float32)
    xf = jnp.pad(xf, ((0, Np - N), (0, 0), (0, HWp - HW)))
    xf = xf.transpose(1, 0, 2)                       # (6, Np, HWp)

    w1f = w1.reshape(-1).astype(jnp.float32)         # (18,)  index: o*6 + c
    w2f = w2.reshape(-1).astype(jnp.float32)         # (81,)  index: ((o*3+c)*3+kh)*3+kw
    w3f = w3.reshape(-1).astype(jnp.float32)         # (18,)  index: o*6 + c

    kernel = _make_kernel(H, W, HWp)

    out = pl.pallas_call(
        kernel,
        out_shape=jax.ShapeDtypeStruct((3, Np, HWp), x.dtype),
        grid=(Np // TB,),
        in_specs=[
            pl.BlockSpec(memory_space=pltpu.MemorySpace.SMEM),
            pl.BlockSpec(memory_space=pltpu.MemorySpace.SMEM),
            pl.BlockSpec(memory_space=pltpu.MemorySpace.SMEM),
            pl.BlockSpec((C, TB, HWp), lambda n: (0, n, 0)),
        ],
        out_specs=pl.BlockSpec((3, TB, HWp), lambda n: (0, n, 0)),
        compiler_params=pltpu.CompilerParams(
            dimension_semantics=("parallel",)),
        cost_estimate=pl.CostEstimate(
            flops=234 * N * HW,            # ~117 MACs per 3-channel pixel
            transcendentals=9 * N * HW,    # 3 exp + 6 tanh per pixel
            bytes_accessed=36 * N * HW),   # 6 in + 3 out channels, f32
    )(w1f, w2f, w3f, xf)

    # Undo layout plumbing: (3, Np, HWp) -> (N, 3, H, W).
    return out.transpose(1, 0, 2)[:N, :, :HW].reshape(N, 3, H, W)


def ref_forward(x, w1, w2, w3):
    """Pure-JAX reference matching the PyTorch module (NCHW, OIHW weights)."""
    dn1 = jax.lax.conv_dimension_numbers(x.shape, w1.shape, ("NCHW", "OIHW", "NCHW"))
    x1 = jax.lax.conv_general_dilated(
        x, w1, (1, 1), "VALID", dimension_numbers=dn1,
        precision=jax.lax.Precision.HIGHEST)
    dn2 = jax.lax.conv_dimension_numbers(x1.shape, w2.shape, ("NCHW", "OIHW", "NCHW"))
    y = jax.lax.conv_general_dilated(
        x1, w2, (1, 1), ((1, 1), (1, 1)), dimension_numbers=dn2,
        precision=jax.lax.Precision.HIGHEST)
    x2 = y * jnp.tanh(_softplus(y))
    x3 = jnp.tanh(jnp.concatenate([x1, x2], axis=1))
    dn3 = jax.lax.conv_dimension_numbers(x3.shape, w3.shape, ("NCHW", "OIHW", "NCHW"))
    x3 = jax.lax.conv_general_dilated(
        x3, w3, (1, 1), "VALID", dimension_numbers=dn3,
        precision=jax.lax.Precision.HIGHEST)
    return x3 * x1


if __name__ == "__main__":
    key = jax.random.PRNGKey(0)
    kx, k1, k2, k3 = jax.random.split(key, 4)

    N, C, H, W = 2, 6, 16, 16
    x = jax.random.normal(kx, (N, C, H, W), dtype=jnp.float32)

    # Deterministic synthetic parameters (shapes from the module's __init__).
    w1 = 0.3 * jax.random.normal(k1, (3, 6, 1, 1), dtype=jnp.float32)  # conv1
    w2 = 0.2 * jax.random.normal(k2, (3, 3, 3, 3), dtype=jnp.float32)  # conv2[0]
    w3 = 0.3 * jax.random.normal(k3, (3, 6, 1, 1), dtype=jnp.float32)  # conv3

    out = jax.block_until_ready(tconv_block_fast(x, w1, w2, w3))
    ref = jax.block_until_ready(ref_forward(x, w1, w2, w3))

    assert out.shape == (N, 3, H, W)
    assert jnp.allclose(out, ref, atol=1e-4, rtol=1e-4), (
        f"max abs diff {jnp.max(jnp.abs(out - ref))}")

    print("KERNEL_OK")
</pallas_src>

<mosaic_0001>
module attributes {stable_mosaic.version = 11 : i64} {
  func.func @kernel(%arg0: i32, %arg1: memref<18xf32, #tpu.memory_space<smem>>, %arg2: memref<81xf32, #tpu.memory_space<smem>>, %arg3: memref<18xf32, #tpu.memory_space<smem>>, %arg4: memref<6x8x256xf32, #tpu.memory_space<vmem>>, %arg5: memref<3x8x256xf32, #tpu.memory_space<vmem>>) attributes {dimension_semantics = [#tpu.dimension_semantics<parallel>], iteration_bounds = array<i64: 1>, scalar_prefetch = 0 : i64, scratch_operands = 0 : i64, tpu.core_type = #tpu.core_type<tc>, window_params = [{transform_indices = @transform_0, window_bounds = array<i64: 18>}, {transform_indices = @transform_1, window_bounds = array<i64: 81>}, {transform_indices = @transform_2, window_bounds = array<i64: 18>}, {transform_indices = @transform_3, window_bounds = array<i64: 6, 8, 256>}, {transform_indices = @transform_4, window_bounds = array<i64: 3, 8, 256>}]} {
    %0 = tpu.iota {dimensions = array<i32: 1>} : vector<8x256xi32>
    %c16_i32 = arith.constant 16 : i32
    %c0_i32 = arith.constant 0 : i32
    %1 = arith.cmpi eq, %c16_i32, %c0_i32 : i32
    %c1_i32 = arith.constant 1 : i32
    %2 = arith.select %1, %c1_i32, %c16_i32 : i32
    %3 = vector.broadcast %2 : i32 to vector<8x256xi32>
    %4 = arith.remsi %0, %3 : vector<8x256xi32>
    %c0_i32_0 = arith.constant 0 : i32
    %5 = vector.broadcast %c0_i32_0 : i32 to vector<8x256xi32>
    %6 = arith.cmpi ne, %4, %5 : vector<8x256xi32>
    %c0_i32_1 = arith.constant 0 : i32
    %7 = vector.broadcast %c0_i32_1 : i32 to vector<8x256xi32>
    %8 = arith.cmpi slt, %4, %7 : vector<8x256xi32>
    %c0_i32_2 = arith.constant 0 : i32
    %9 = arith.cmpi slt, %2, %c0_i32_2 : i32
    %10 = vector.broadcast %9 : i1 to vector<8x256xi1>
    %11 = vector.broadcast %10 : vector<8x256xi1> to vector<8x256xi1>
    %12 = arith.xori %8, %11 : vector<8x256xi1>
    %13 = arith.andi %12, %6 : vector<8x256xi1>
    %14 = vector.broadcast %2 : i32 to vector<8x256xi32>
    %15 = arith.addi %4, %14 : vector<8x256xi32>
    %16 = arith.select %13, %15, %4 : vector<8x256xi1>, vector<8x256xi32>
    %c16_i32_3 = arith.constant 16 : i32
    %17 = vector.broadcast %c16_i32_3 : i32 to vector<8x256xi32>
    %18 = arith.cmpi sge, %0, %17 : vector<8x256xi32>
    %c240_i32 = arith.constant 240 : i32
    %19 = vector.broadcast %c240_i32 : i32 to vector<8x256xi32>
    %20 = arith.cmpi slt, %0, %19 : vector<8x256xi32>
    %c1_i32_4 = arith.constant 1 : i32
    %21 = vector.broadcast %c1_i32_4 : i32 to vector<8x256xi32>
    %22 = arith.cmpi sge, %16, %21 : vector<8x256xi32>
    %c14_i32 = arith.constant 14 : i32
    %23 = vector.broadcast %c14_i32 : i32 to vector<8x256xi32>
    %24 = arith.cmpi sle, %16, %23 : vector<8x256xi32>
    %c0 = arith.constant 0 : index
    %25 = memref.load %arg1[%c0] : memref<18xf32, #tpu.memory_space<smem>>
    %c0_5 = arith.constant 0 : index
    %c0_6 = arith.constant 0 : index
    %c0_7 = arith.constant 0 : index
    %26 = vector.load %arg4[%c0_5, %c0_6, %c0_7] : memref<6x8x256xf32, #tpu.memory_space<vmem>>, vector<1x8x256xf32>
    %27 = vector.shape_cast %26 : vector<1x8x256xf32> to vector<8x256xf32>
    %28 = vector.broadcast %25 : f32 to vector<8x256xf32>
    %29 = arith.mulf %28, %27 : vector<8x256xf32>
    %c1 = arith.constant 1 : index
    %30 = memref.load %arg1[%c1] : memref<18xf32, #tpu.memory_space<smem>>
    %c1_8 = arith.constant 1 : index
    %c0_9 = arith.constant 0 : index
    %c0_10 = arith.constant 0 : index
    %31 = vector.load %arg4[%c1_8, %c0_9, %c0_10] : memref<6x8x256xf32, #tpu.memory_space<vmem>>, vector<1x8x256xf32>
    %32 = vector.shape_cast %31 : vector<1x8x256xf32> to vector<8x256xf32>
    %33 = vector.broadcast %30 : f32 to vector<8x256xf32>
    %34 = arith.mulf %33, %32 : vector<8x256xf32>
    %35 = arith.addf %29, %34 : vector<8x256xf32>
    %c2 = arith.constant 2 : index
    %36 = memref.load %arg1[%c2] : memref<18xf32, #tpu.memory_space<smem>>
    %c2_11 = arith.constant 2 : index
    %c0_12 = arith.constant 0 : index
    %c0_13 = arith.constant 0 : index
    %37 = vector.load %arg4[%c2_11, %c0_12, %c0_13] : memref<6x8x256xf32, #tpu.memory_space<vmem>>, vector<1x8x256xf32>
    %38 = vector.shape_cast %37 : vector<1x8x256xf32> to vector<8x256xf32>
    %39 = vector.broadcast %36 : f32 to vector<8x256xf32>
    %40 = arith.mulf %39, %38 : vector<8x256xf32>
    %41 = arith.addf %35, %40 : vector<8x256xf32>
    %c3 = arith.constant 3 : index
    %42 = memref.load %arg1[%c3] : memref<18xf32, #tpu.memory_space<smem>>
    %c3_14 = arith.constant 3 : index
    %c0_15 = arith.constant 0 : index
    %c0_16 = arith.constant 0 : index
    %43 = vector.load %arg4[%c3_14, %c0_15, %c0_16] : memref<6x8x256xf32, #tpu.memory_space<vmem>>, vector<1x8x256xf32>
    %44 = vector.shape_cast %43 : vector<1x8x256xf32> to vector<8x256xf32>
    %45 = vector.broadcast %42 : f32 to vector<8x256xf32>
    %46 = arith.mulf %45, %44 : vector<8x256xf32>
    %47 = arith.addf %41, %46 : vector<8x256xf32>
    %c4 = arith.constant 4 : index
    %48 = memref.load %arg1[%c4] : memref<18xf32, #tpu.memory_space<smem>>
    %c4_17 = arith.constant 4 : index
    %c0_18 = arith.constant 0 : index
    %c0_19 = arith.constant 0 : index
    %49 = vector.load %arg4[%c4_17, %c0_18, %c0_19] : memref<6x8x256xf32, #tpu.memory_space<vmem>>, vector<1x8x256xf32>
    %50 = vector.shape_cast %49 : vector<1x8x256xf32> to vector<8x256xf32>
    %51 = vector.broadcast %48 : f32 to vector<8x256xf32>
    %52 = arith.mulf %51, %50 : vector<8x256xf32>
    %53 = arith.addf %47, %52 : vector<8x256xf32>
    %c5 = arith.constant 5 : index
    %54 = memref.load %arg1[%c5] : memref<18xf32, #tpu.memory_space<smem>>
    %c5_20 = arith.constant 5 : index
    %c0_21 = arith.constant 0 : index
    %c0_22 = arith.constant 0 : index
    %55 = vector.load %arg4[%c5_20, %c0_21, %c0_22] : memref<6x8x256xf32, #tpu.memory_space<vmem>>, vector<1x8x256xf32>
    %56 = vector.shape_cast %55 : vector<1x8x256xf32> to vector<8x256xf32>
    %57 = vector.broadcast %54 : f32 to vector<8x256xf32>
    %58 = arith.mulf %57, %56 : vector<8x256xf32>
    %59 = arith.addf %53, %58 : vector<8x256xf32>
    %c6 = arith.constant 6 : index
    %60 = memref.load %arg1[%c6] : memref<18xf32, #tpu.memory_space<smem>>
    %c0_23 = arith.constant 0 : index
    %c0_24 = arith.constant 0 : index
    %c0_25 = arith.constant 0 : index
    %61 = vector.load %arg4[%c0_23, %c0_24, %c0_25] : memref<6x8x256xf32, #tpu.memory_space<vmem>>, vector<1x8x256xf32>
    %62 = vector.shape_cast %61 : vector<1x8x256xf32> to vector<8x256xf32>
    %63 = vector.broadcast %60 : f32 to vector<8x256xf32>
    %64 = arith.mulf %63, %62 : vector<8x256xf32>
    %c7 = arith.constant 7 : index
    %65 = memref.load %arg1[%c7] : memref<18xf32, #tpu.memory_space<smem>>
    %c1_26 = arith.constant 1 : index
    %c0_27 = arith.constant 0 : index
    %c0_28 = arith.constant 0 : index
    %66 = vector.load %arg4[%c1_26, %c0_27, %c0_28] : memref<6x8x256xf32, #tpu.memory_space<vmem>>, vector<1x8x256xf32>
    %67 = vector.shape_cast %66 : vector<1x8x256xf32> to vector<8x256xf32>
    %68 = vector.broadcast %65 : f32 to vector<8x256xf32>
    %69 = arith.mulf %68, %67 : vector<8x256xf32>
    %70 = arith.addf %64, %69 : vector<8x256xf32>
    %c8 = arith.constant 8 : index
    %71 = memref.load %arg1[%c8] : memref<18xf32, #tpu.memory_space<smem>>
    %c2_29 = arith.constant 2 : index
    %c0_30 = arith.constant 0 : index
    %c0_31 = arith.constant 0 : index
    %72 = vector.load %arg4[%c2_29, %c0_30, %c0_31] : memref<6x8x256xf32, #tpu.memory_space<vmem>>, vector<1x8x256xf32>
    %73 = vector.shape_cast %72 : vector<1x8x256xf32> to vector<8x256xf32>
    %74 = vector.broadcast %71 : f32 to vector<8x256xf32>
    %75 = arith.mulf %74, %73 : vector<8x256xf32>
    %76 = arith.addf %70, %75 : vector<8x256xf32>
    %c9 = arith.constant 9 : index
    %77 = memref.load %arg1[%c9] : memref<18xf32, #tpu.memory_space<smem>>
    %c3_32 = arith.constant 3 : index
    %c0_33 = arith.constant 0 : index
    %c0_34 = arith.constant 0 : index
    %78 = vector.load %arg4[%c3_32, %c0_33, %c0_34] : memref<6x8x256xf32, #tpu.memory_space<vmem>>, vector<1x8x256xf32>
    %79 = vector.shape_cast %78 : vector<1x8x256xf32> to vector<8x256xf32>
    %80 = vector.broadcast %77 : f32 to vector<8x256xf32>
    %81 = arith.mulf %80, %79 : vector<8x256xf32>
    %82 = arith.addf %76, %81 : vector<8x256xf32>
    %c10 = arith.constant 10 : index
    %83 = memref.load %arg1[%c10] : memref<18xf32, #tpu.memory_space<smem>>
    %c4_35 = arith.constant 4 : index
    %c0_36 = arith.constant 0 : index
    %c0_37 = arith.constant 0 : index
    %84 = vector.load %arg4[%c4_35, %c0_36, %c0_37] : memref<6x8x256xf32, #tpu.memory_space<vmem>>, vector<1x8x256xf32>
    %85 = vector.shape_cast %84 : vector<1x8x256xf32> to vector<8x256xf32>
    %86 = vector.broadcast %83 : f32 to vector<8x256xf32>
    %87 = arith.mulf %86, %85 : vector<8x256xf32>
    %88 = arith.addf %82, %87 : vector<8x256xf32>
    %c11 = arith.constant 11 : index
    %89 = memref.load %arg1[%c11] : memref<18xf32, #tpu.memory_space<smem>>
    %c5_38 = arith.constant 5 : index
    %c0_39 = arith.constant 0 : index
    %c0_40 = arith.constant 0 : index
    %90 = vector.load %arg4[%c5_38, %c0_39, %c0_40] : memref<6x8x256xf32, #tpu.memory_space<vmem>>, vector<1x8x256xf32>
    %91 = vector.shape_cast %90 : vector<1x8x256xf32> to vector<8x256xf32>
    %92 = vector.broadcast %89 : f32 to vector<8x256xf32>
    %93 = arith.mulf %92, %91 : vector<8x256xf32>
    %94 = arith.addf %88, %93 : vector<8x256xf32>
    %c12 = arith.constant 12 : index
    %95 = memref.load %arg1[%c12] : memref<18xf32, #tpu.memory_space<smem>>
    %c0_41 = arith.constant 0 : index
    %c0_42 = arith.constant 0 : index
    %c0_43 = arith.constant 0 : index
    %96 = vector.load %arg4[%c0_41, %c0_42, %c0_43] : memref<6x8x256xf32, #tpu.memory_space<vmem>>, vector<1x8x256xf32>
    %97 = vector.shape_cast %96 : vector<1x8x256xf32> to vector<8x256xf32>
    %98 = vector.broadcast %95 : f32 to vector<8x256xf32>
    %99 = arith.mulf %98, %97 : vector<8x256xf32>
    %c13 = arith.constant 13 : index
    %100 = memref.load %arg1[%c13] : memref<18xf32, #tpu.memory_space<smem>>
    %c1_44 = arith.constant 1 : index
    %c0_45 = arith.constant 0 : index
    %c0_46 = arith.constant 0 : index
    %101 = vector.load %arg4[%c1_44, %c0_45, %c0_46] : memref<6x8x256xf32, #tpu.memory_space<vmem>>, vector<1x8x256xf32>
    %102 = vector.shape_cast %101 : vector<1x8x256xf32> to vector<8x256xf32>
    %103 = vector.broadcast %100 : f32 to vector<8x256xf32>
    %104 = arith.mulf %103, %102 : vector<8x256xf32>
    %105 = arith.addf %99, %104 : vector<8x256xf32>
    %c14 = arith.constant 14 : index
    %106 = memref.load %arg1[%c14] : memref<18xf32, #tpu.memory_space<smem>>
    %c2_47 = arith.constant 2 : index
    %c0_48 = arith.constant 0 : index
    %c0_49 = arith.constant 0 : index
    %107 = vector.load %arg4[%c2_47, %c0_48, %c0_49] : memref<6x8x256xf32, #tpu.memory_space<vmem>>, vector<1x8x256xf32>
    %108 = vector.shape_cast %107 : vector<1x8x256xf32> to vector<8x256xf32>
    %109 = vector.broadcast %106 : f32 to vector<8x256xf32>
    %110 = arith.mulf %109, %108 : vector<8x256xf32>
    %111 = arith.addf %105, %110 : vector<8x256xf32>
    %c15 = arith.constant 15 : index
    %112 = memref.load %arg1[%c15] : memref<18xf32, #tpu.memory_space<smem>>
    %c3_50 = arith.constant 3 : index
    %c0_51 = arith.constant 0 : index
    %c0_52 = arith.constant 0 : index
    %113 = vector.load %arg4[%c3_50, %c0_51, %c0_52] : memref<6x8x256xf32, #tpu.memory_space<vmem>>, vector<1x8x256xf32>
    %114 = vector.shape_cast %113 : vector<1x8x256xf32> to vector<8x256xf32>
    %115 = vector.broadcast %112 : f32 to vector<8x256xf32>
    %116 = arith.mulf %115, %114 : vector<8x256xf32>
    %117 = arith.addf %111, %116 : vector<8x256xf32>
    %c16 = arith.constant 16 : index
    %118 = memref.load %arg1[%c16] : memref<18xf32, #tpu.memory_space<smem>>
    %c4_53 = arith.constant 4 : index
    %c0_54 = arith.constant 0 : index
    %c0_55 = arith.constant 0 : index
    %119 = vector.load %arg4[%c4_53, %c0_54, %c0_55] : memref<6x8x256xf32, #tpu.memory_space<vmem>>, vector<1x8x256xf32>
    %120 = vector.shape_cast %119 : vector<1x8x256xf32> to vector<8x256xf32>
    %121 = vector.broadcast %118 : f32 to vector<8x256xf32>
    %122 = arith.mulf %121, %120 : vector<8x256xf32>
    %123 = arith.addf %117, %122 : vector<8x256xf32>
    %c17 = arith.constant 17 : index
    %124 = memref.load %arg1[%c17] : memref<18xf32, #tpu.memory_space<smem>>
    %c5_56 = arith.constant 5 : index
    %c0_57 = arith.constant 0 : index
    %c0_58 = arith.constant 0 : index
    %125 = vector.load %arg4[%c5_56, %c0_57, %c0_58] : memref<6x8x256xf32, #tpu.memory_space<vmem>>, vector<1x8x256xf32>
    %126 = vector.shape_cast %125 : vector<1x8x256xf32> to vector<8x256xf32>
    %127 = vector.broadcast %124 : f32 to vector<8x256xf32>
    %128 = arith.mulf %127, %126 : vector<8x256xf32>
    %129 = arith.addf %123, %128 : vector<8x256xf32>
    %cst = arith.constant 0.000000e+00 : f32
    %130 = vector.broadcast %cst : f32 to vector<8x256xf32>
    %cst_59 = arith.constant 0.000000e+00 : f32
    %131 = vector.broadcast %cst_59 : f32 to vector<8x256xf32>
    %cst_60 = arith.constant 0.000000e+00 : f32
    %132 = vector.broadcast %cst_60 : f32 to vector<8x256xf32>
    %c16_i32_61 = arith.constant 16 : i32
    %133 = tpu.dynamic_rotate %59 by %c16_i32_61 dim 1 : vector<8x256xf32>, i32 -> vector<8x256xf32>
    %cst_62 = arith.constant 0.000000e+00 : f32
    %134 = vector.broadcast %cst_62 : f32 to vector<8x256xf32>
    %135 = arith.select %18, %133, %134 : vector<8x256xi1>, vector<8x256xf32>
    %c1_i32_63 = arith.constant 1 : i32
    %136 = tpu.dynamic_rotate %135 by %c1_i32_63 dim 1 : vector<8x256xf32>, i32 -> vector<8x256xf32>
    %cst_64 = arith.constant 0.000000e+00 : f32
    %137 = vector.broadcast %cst_64 : f32 to vector<8x256xf32>
    %138 = arith.select %22, %136, %137 : vector<8x256xi1>, vector<8x256xf32>
    %c0_65 = arith.constant 0 : index
    %139 = memref.load %arg2[%c0_65] : memref<81xf32, #tpu.memory_space<smem>>
    %140 = vector.broadcast %139 : f32 to vector<8x256xf32>
    %141 = arith.mulf %140, %138 : vector<8x256xf32>
    %142 = arith.addf %130, %141 : vector<8x256xf32>
    %c27 = arith.constant 27 : index
    %143 = memref.load %arg2[%c27] : memref<81xf32, #tpu.memory_space<smem>>
    %144 = vector.broadcast %143 : f32 to vector<8x256xf32>
    %145 = arith.mulf %144, %138 : vector<8x256xf32>
    %146 = arith.addf %131, %145 : vector<8x256xf32>
    %c54 = arith.constant 54 : index
    %147 = memref.load %arg2[%c54] : memref<81xf32, #tpu.memory_space<smem>>
    %148 = vector.broadcast %147 : f32 to vector<8x256xf32>
    %149 = arith.mulf %148, %138 : vector<8x256xf32>
    %150 = arith.addf %132, %149 : vector<8x256xf32>
    %c1_66 = arith.constant 1 : index
    %151 = memref.load %arg2[%c1_66] : memref<81xf32, #tpu.memory_space<smem>>
    %152 = vector.broadcast %151 : f32 to vector<8x256xf32>
    %153 = arith.mulf %152, %135 : vector<8x256xf32>
    %154 = arith.addf %142, %153 : vector<8x256xf32>
    %c28 = arith.constant 28 : index
    %155 = memref.load %arg2[%c28] : memref<81xf32, #tpu.memory_space<smem>>
    %156 = vector.broadcast %155 : f32 to vector<8x256xf32>
    %157 = arith.mulf %156, %135 : vector<8x256xf32>
    %158 = arith.addf %146, %157 : vector<8x256xf32>
    %c55 = arith.constant 55 : index
    %159 = memref.load %arg2[%c55] : memref<81xf32, #tpu.memory_space<smem>>
    %160 = vector.broadcast %159 : f32 to vector<8x256xf32>
    %161 = arith.mulf %160, %135 : vector<8x256xf32>
    %162 = arith.addf %150, %161 : vector<8x256xf32>
    %c255_i32 = arith.constant 255 : i32
    %163 = tpu.dynamic_rotate %135 by %c255_i32 dim 1 : vector<8x256xf32>, i32 -> vector<8x256xf32>
    %cst_67 = arith.constant 0.000000e+00 : f32
    %164 = vector.broadcast %cst_67 : f32 to vector<8x256xf32>
    %165 = arith.select %24, %163, %164 : vector<8x256xi1>, vector<8x256xf32>
    %c2_68 = arith.constant 2 : index
    %166 = memref.load %arg2[%c2_68] : memref<81xf32, #tpu.memory_space<smem>>
    %167 = vector.broadcast %166 : f32 to vector<8x256xf32>
    %168 = arith.mulf %167, %165 : vector<8x256xf32>
    %169 = arith.addf %154, %168 : vector<8x256xf32>
    %c29 = arith.constant 29 : index
    %170 = memref.load %arg2[%c29] : memref<81xf32, #tpu.memory_space<smem>>
    %171 = vector.broadcast %170 : f32 to vector<8x256xf32>
    %172 = arith.mulf %171, %165 : vector<8x256xf32>
    %173 = arith.addf %158, %172 : vector<8x256xf32>
    %c56 = arith.constant 56 : index
    %174 = memref.load %arg2[%c56] : memref<81xf32, #tpu.memory_space<smem>>
    %175 = vector.broadcast %174 : f32 to vector<8x256xf32>
    %176 = arith.mulf %175, %165 : vector<8x256xf32>
    %177 = arith.addf %162, %176 : vector<8x256xf32>
    %c1_i32_69 = arith.constant 1 : i32
    %178 = tpu.dynamic_rotate %59 by %c1_i32_69 dim 1 : vector<8x256xf32>, i32 -> vector<8x256xf32>
    %cst_70 = arith.constant 0.000000e+00 : f32
    %179 = vector.broadcast %cst_70 : f32 to vector<8x256xf32>
    %180 = arith.select %22, %178, %179 : vector<8x256xi1>, vector<8x256xf32>
    %c3_71 = arith.constant 3 : index
    %181 = memref.load %arg2[%c3_71] : memref<81xf32, #tpu.memory_space<smem>>
    %182 = vector.broadcast %181 : f32 to vector<8x256xf32>
    %183 = arith.mulf %182, %180 : vector<8x256xf32>
    %184 = arith.addf %169, %183 : vector<8x256xf32>
    %c30 = arith.constant 30 : index
    %185 = memref.load %arg2[%c30] : memref<81xf32, #tpu.memory_space<smem>>
    %186 = vector.broadcast %185 : f32 to vector<8x256xf32>
    %187 = arith.mulf %186, %180 : vector<8x256xf32>
    %188 = arith.addf %173, %187 : vector<8x256xf32>
    %c57 = arith.constant 57 : index
    %189 = memref.load %arg2[%c57] : memref<81xf32, #tpu.memory_space<smem>>
    %190 = vector.broadcast %189 : f32 to vector<8x256xf32>
    %191 = arith.mulf %190, %180 : vector<8x256xf32>
    %192 = arith.addf %177, %191 : vector<8x256xf32>
    %c4_72 = arith.constant 4 : index
    %193 = memref.load %arg2[%c4_72] : memref<81xf32, #tpu.memory_space<smem>>
    %194 = vector.broadcast %193 : f32 to vector<8x256xf32>
    %195 = arith.mulf %194, %59 : vector<8x256xf32>
    %196 = arith.addf %184, %195 : vector<8x256xf32>
    %c31 = arith.constant 31 : index
    %197 = memref.load %arg2[%c31] : memref<81xf32, #tpu.memory_space<smem>>
    %198 = vector.broadcast %197 : f32 to vector<8x256xf32>
    %199 = arith.mulf %198, %59 : vector<8x256xf32>
    %200 = arith.addf %188, %199 : vector<8x256xf32>
    %c58 = arith.constant 58 : index
    %201 = memref.load %arg2[%c58] : memref<81xf32, #tpu.memory_space<smem>>
    %202 = vector.broadcast %201 : f32 to vector<8x256xf32>
    %203 = arith.mulf %202, %59 : vector<8x256xf32>
    %204 = arith.addf %192, %203 : vector<8x256xf32>
    %c255_i32_73 = arith.constant 255 : i32
    %205 = tpu.dynamic_rotate %59 by %c255_i32_73 dim 1 : vector<8x256xf32>, i32 -> vector<8x256xf32>
    %cst_74 = arith.constant 0.000000e+00 : f32
    %206 = vector.broadcast %cst_74 : f32 to vector<8x256xf32>
    %207 = arith.select %24, %205, %206 : vector<8x256xi1>, vector<8x256xf32>
    %c5_75 = arith.constant 5 : index
    %208 = memref.load %arg2[%c5_75] : memref<81xf32, #tpu.memory_space<smem>>
    %209 = vector.broadcast %208 : f32 to vector<8x256xf32>
    %210 = arith.mulf %209, %207 : vector<8x256xf32>
    %211 = arith.addf %196, %210 : vector<8x256xf32>
    %c32 = arith.constant 32 : index
    %212 = memref.load %arg2[%c32] : memref<81xf32, #tpu.memory_space<smem>>
    %213 = vector.broadcast %212 : f32 to vector<8x256xf32>
    %214 = arith.mulf %213, %207 : vector<8x256xf32>
    %215 = arith.addf %200, %214 : vector<8x256xf32>
    %c59 = arith.constant 59 : index
    %216 = memref.load %arg2[%c59] : memref<81xf32, #tpu.memory_space<smem>>
    %217 = vector.broadcast %216 : f32 to vector<8x256xf32>
    %218 = arith.mulf %217, %207 : vector<8x256xf32>
    %219 = arith.addf %204, %218 : vector<8x256xf32>
    %c240_i32_76 = arith.constant 240 : i32
    %220 = tpu.dynamic_rotate %59 by %c240_i32_76 dim 1 : vector<8x256xf32>, i32 -> vector<8x256xf32>
    %cst_77 = arith.constant 0.000000e+00 : f32
    %221 = vector.broadcast %cst_77 : f32 to vector<8x256xf32>
    %222 = arith.select %20, %220, %221 : vector<8x256xi1>, vector<8x256xf32>
    %c1_i32_78 = arith.constant 1 : i32
    %223 = tpu.dynamic_rotate %222 by %c1_i32_78 dim 1 : vector<8x256xf32>, i32 -> vector<8x256xf32>
    %cst_79 = arith.constant 0.000000e+00 : f32
    %224 = vector.broadcast %cst_79 : f32 to vector<8x256xf32>
    %225 = arith.select %22, %223, %224 : vector<8x256xi1>, vector<8x256xf32>
    %c6_80 = arith.constant 6 : index
    %226 = memref.load %arg2[%c6_80] : memref<81xf32, #tpu.memory_space<smem>>
    %227 = vector.broadcast %226 : f32 to vector<8x256xf32>
    %228 = arith.mulf %227, %225 : vector<8x256xf32>
    %229 = arith.addf %211, %228 : vector<8x256xf32>
    %c33 = arith.constant 33 : index
    %230 = memref.load %arg2[%c33] : memref<81xf32, #tpu.memory_space<smem>>
    %231 = vector.broadcast %230 : f32 to vector<8x256xf32>
    %232 = arith.mulf %231, %225 : vector<8x256xf32>
    %233 = arith.addf %215, %232 : vector<8x256xf32>
    %c60 = arith.constant 60 : index
    %234 = memref.load %arg2[%c60] : memref<81xf32, #tpu.memory_space<smem>>
    %235 = vector.broadcast %234 : f32 to vector<8x256xf32>
    %236 = arith.mulf %235, %225 : vector<8x256xf32>
    %237 = arith.addf %219, %236 : vector<8x256xf32>
    %c7_81 = arith.constant 7 : index
    %238 = memref.load %arg2[%c7_81] : memref<81xf32, #tpu.memory_space<smem>>
    %239 = vector.broadcast %238 : f32 to vector<8x256xf32>
    %240 = arith.mulf %239, %222 : vector<8x256xf32>
    %241 = arith.addf %229, %240 : vector<8x256xf32>
    %c34 = arith.constant 34 : index
    %242 = memref.load %arg2[%c34] : memref<81xf32, #tpu.memory_space<smem>>
    %243 = vector.broadcast %242 : f32 to vector<8x256xf32>
    %244 = arith.mulf %243, %222 : vector<8x256xf32>
    %245 = arith.addf %233, %244 : vector<8x256xf32>
    %c61 = arith.constant 61 : index
    %246 = memref.load %arg2[%c61] : memref<81xf32, #tpu.memory_space<smem>>
    %247 = vector.broadcast %246 : f32 to vector<8x256xf32>
    %248 = arith.mulf %247, %222 : vector<8x256xf32>
    %249 = arith.addf %237, %248 : vector<8x256xf32>
    %c255_i32_82 = arith.constant 255 : i32
    %250 = tpu.dynamic_rotate %222 by %c255_i32_82 dim 1 : vector<8x256xf32>, i32 -> vector<8x256xf32>
    %cst_83 = arith.constant 0.000000e+00 : f32
    %251 = vector.broadcast %cst_83 : f32 to vector<8x256xf32>
    %252 = arith.select %24, %250, %251 : vector<8x256xi1>, vector<8x256xf32>
    %c8_84 = arith.constant 8 : index
    %253 = memref.load %arg2[%c8_84] : memref<81xf32, #tpu.memory_space<smem>>
    %254 = vector.broadcast %253 : f32 to vector<8x256xf32>
    %255 = arith.mulf %254, %252 : vector<8x256xf32>
    %256 = arith.addf %241, %255 : vector<8x256xf32>
    %c35 = arith.constant 35 : index
    %257 = memref.load %arg2[%c35] : memref<81xf32, #tpu.memory_space<smem>>
    %258 = vector.broadcast %257 : f32 to vector<8x256xf32>
    %259 = arith.mulf %258, %252 : vector<8x256xf32>
    %260 = arith.addf %245, %259 : vector<8x256xf32>
    %c62 = arith.constant 62 : index
    %261 = memref.load %arg2[%c62] : memref<81xf32, #tpu.memory_space<smem>>
    %262 = vector.broadcast %261 : f32 to vector<8x256xf32>
    %263 = arith.mulf %262, %252 : vector<8x256xf32>
    %264 = arith.addf %249, %263 : vector<8x256xf32>
    %c16_i32_85 = arith.constant 16 : i32
    %265 = tpu.dynamic_rotate %94 by %c16_i32_85 dim 1 : vector<8x256xf32>, i32 -> vector<8x256xf32>
    %cst_86 = arith.constant 0.000000e+00 : f32
    %266 = vector.broadcast %cst_86 : f32 to vector<8x256xf32>
    %267 = arith.select %18, %265, %266 : vector<8x256xi1>, vector<8x256xf32>
    %c1_i32_87 = arith.constant 1 : i32
    %268 = tpu.dynamic_rotate %267 by %c1_i32_87 dim 1 : vector<8x256xf32>, i32 -> vector<8x256xf32>
    %cst_88 = arith.constant 0.000000e+00 : f32
    %269 = vector.broadcast %cst_88 : f32 to vector<8x256xf32>
    %270 = arith.select %22, %268, %269 : vector<8x256xi1>, vector<8x256xf32>
    %c9_89 = arith.constant 9 : index
    %271 = memref.load %arg2[%c9_89] : memref<81xf32, #tpu.memory_space<smem>>
    %272 = vector.broadcast %271 : f32 to vector<8x256xf32>
    %273 = arith.mulf %272, %270 : vector<8x256xf32>
    %274 = arith.addf %256, %273 : vector<8x256xf32>
    %c36 = arith.constant 36 : index
    %275 = memref.load %arg2[%c36] : memref<81xf32, #tpu.memory_space<smem>>
    %276 = vector.broadcast %275 : f32 to vector<8x256xf32>
    %277 = arith.mulf %276, %270 : vector<8x256xf32>
    %278 = arith.addf %260, %277 : vector<8x256xf32>
    %c63 = arith.constant 63 : index
    %279 = memref.load %arg2[%c63] : memref<81xf32, #tpu.memory_space<smem>>
    %280 = vector.broadcast %279 : f32 to vector<8x256xf32>
    %281 = arith.mulf %280, %270 : vector<8x256xf32>
    %282 = arith.addf %264, %281 : vector<8x256xf32>
    %c10_90 = arith.constant 10 : index
    %283 = memref.load %arg2[%c10_90] : memref<81xf32, #tpu.memory_space<smem>>
    %284 = vector.broadcast %283 : f32 to vector<8x256xf32>
    %285 = arith.mulf %284, %267 : vector<8x256xf32>
    %286 = arith.addf %274, %285 : vector<8x256xf32>
    %c37 = arith.constant 37 : index
    %287 = memref.load %arg2[%c37] : memref<81xf32, #tpu.memory_space<smem>>
    %288 = vector.broadcast %287 : f32 to vector<8x256xf32>
    %289 = arith.mulf %288, %267 : vector<8x256xf32>
    %290 = arith.addf %278, %289 : vector<8x256xf32>
    %c64 = arith.constant 64 : index
    %291 = memref.load %arg2[%c64] : memref<81xf32, #tpu.memory_space<smem>>
    %292 = vector.broadcast %291 : f32 to vector<8x256xf32>
    %293 = arith.mulf %292, %267 : vector<8x256xf32>
    %294 = arith.addf %282, %293 : vector<8x256xf32>
    %c255_i32_91 = arith.constant 255 : i32
    %295 = tpu.dynamic_rotate %267 by %c255_i32_91 dim 1 : vector<8x256xf32>, i32 -> vector<8x256xf32>
    %cst_92 = arith.constant 0.000000e+00 : f32
    %296 = vector.broadcast %cst_92 : f32 to vector<8x256xf32>
    %297 = arith.select %24, %295, %296 : vector<8x256xi1>, vector<8x256xf32>
    %c11_93 = arith.constant 11 : index
    %298 = memref.load %arg2[%c11_93] : memref<81xf32, #tpu.memory_space<smem>>
    %299 = vector.broadcast %298 : f32 to vector<8x256xf32>
    %300 = arith.mulf %299, %297 : vector<8x256xf32>
    %301 = arith.addf %286, %300 : vector<8x256xf32>
    %c38 = arith.constant 38 : index
    %302 = memref.load %arg2[%c38] : memref<81xf32, #tpu.memory_space<smem>>
    %303 = vector.broadcast %302 : f32 to vector<8x256xf32>
    %304 = arith.mulf %303, %297 : vector<8x256xf32>
    %305 = arith.addf %290, %304 : vector<8x256xf32>
    %c65 = arith.constant 65 : index
    %306 = memref.load %arg2[%c65] : memref<81xf32, #tpu.memory_space<smem>>
    %307 = vector.broadcast %306 : f32 to vector<8x256xf32>
    %308 = arith.mulf %307, %297 : vector<8x256xf32>
    %309 = arith.addf %294, %308 : vector<8x256xf32>
    %c1_i32_94 = arith.constant 1 : i32
    %310 = tpu.dynamic_rotate %94 by %c1_i32_94 dim 1 : vector<8x256xf32>, i32 -> vector<8x256xf32>
    %cst_95 = arith.constant 0.000000e+00 : f32
    %311 = vector.broadcast %cst_95 : f32 to vector<8x256xf32>
    %312 = arith.select %22, %310, %311 : vector<8x256xi1>, vector<8x256xf32>
    %c12_96 = arith.constant 12 : index
    %313 = memref.load %arg2[%c12_96] : memref<81xf32, #tpu.memory_space<smem>>
    %314 = vector.broadcast %313 : f32 to vector<8x256xf32>
    %315 = arith.mulf %314, %312 : vector<8x256xf32>
    %316 = arith.addf %301, %315 : vector<8x256xf32>
    %c39 = arith.constant 39 : index
    %317 = memref.load %arg2[%c39] : memref<81xf32, #tpu.memory_space<smem>>
    %318 = vector.broadcast %317 : f32 to vector<8x256xf32>
    %319 = arith.mulf %318, %312 : vector<8x256xf32>
    %320 = arith.addf %305, %319 : vector<8x256xf32>
    %c66 = arith.constant 66 : index
    %321 = memref.load %arg2[%c66] : memref<81xf32, #tpu.memory_space<smem>>
    %322 = vector.broadcast %321 : f32 to vector<8x256xf32>
    %323 = arith.mulf %322, %312 : vector<8x256xf32>
    %324 = arith.addf %309, %323 : vector<8x256xf32>
    %c13_97 = arith.constant 13 : index
    %325 = memref.load %arg2[%c13_97] : memref<81xf32, #tpu.memory_space<smem>>
    %326 = vector.broadcast %325 : f32 to vector<8x256xf32>
    %327 = arith.mulf %326, %94 : vector<8x256xf32>
    %328 = arith.addf %316, %327 : vector<8x256xf32>
    %c40 = arith.constant 40 : index
    %329 = memref.load %arg2[%c40] : memref<81xf32, #tpu.memory_space<smem>>
    %330 = vector.broadcast %329 : f32 to vector<8x256xf32>
    %331 = arith.mulf %330, %94 : vector<8x256xf32>
    %332 = arith.addf %320, %331 : vector<8x256xf32>
    %c67 = arith.constant 67 : index
    %333 = memref.load %arg2[%c67] : memref<81xf32, #tpu.memory_space<smem>>
    %334 = vector.broadcast %333 : f32 to vector<8x256xf32>
    %335 = arith.mulf %334, %94 : vector<8x256xf32>
    %336 = arith.addf %324, %335 : vector<8x256xf32>
    %c255_i32_98 = arith.constant 255 : i32
    %337 = tpu.dynamic_rotate %94 by %c255_i32_98 dim 1 : vector<8x256xf32>, i32 -> vector<8x256xf32>
    %cst_99 = arith.constant 0.000000e+00 : f32
    %338 = vector.broadcast %cst_99 : f32 to vector<8x256xf32>
    %339 = arith.select %24, %337, %338 : vector<8x256xi1>, vector<8x256xf32>
    %c14_100 = arith.constant 14 : index
    %340 = memref.load %arg2[%c14_100] : memref<81xf32, #tpu.memory_space<smem>>
    %341 = vector.broadcast %340 : f32 to vector<8x256xf32>
    %342 = arith.mulf %341, %339 : vector<8x256xf32>
    %343 = arith.addf %328, %342 : vector<8x256xf32>
    %c41 = arith.constant 41 : index
    %344 = memref.load %arg2[%c41] : memref<81xf32, #tpu.memory_space<smem>>
    %345 = vector.broadcast %344 : f32 to vector<8x256xf32>
    %346 = arith.mulf %345, %339 : vector<8x256xf32>
    %347 = arith.addf %332, %346 : vector<8x256xf32>
    %c68 = arith.constant 68 : index
    %348 = memref.load %arg2[%c68] : memref<81xf32, #tpu.memory_space<smem>>
    %349 = vector.broadcast %348 : f32 to vector<8x256xf32>
    %350 = arith.mulf %349, %339 : vector<8x256xf32>
    %351 = arith.addf %336, %350 : vector<8x256xf32>
    %c240_i32_101 = arith.constant 240 : i32
    %352 = tpu.dynamic_rotate %94 by %c240_i32_101 dim 1 : vector<8x256xf32>, i32 -> vector<8x256xf32>
    %cst_102 = arith.constant 0.000000e+00 : f32
    %353 = vector.broadcast %cst_102 : f32 to vector<8x256xf32>
    %354 = arith.select %20, %352, %353 : vector<8x256xi1>, vector<8x256xf32>
    %c1_i32_103 = arith.constant 1 : i32
    %355 = tpu.dynamic_rotate %354 by %c1_i32_103 dim 1 : vector<8x256xf32>, i32 -> vector<8x256xf32>
    %cst_104 = arith.constant 0.000000e+00 : f32
    %356 = vector.broadcast %cst_104 : f32 to vector<8x256xf32>
    %357 = arith.select %22, %355, %356 : vector<8x256xi1>, vector<8x256xf32>
    %c15_105 = arith.constant 15 : index
    %358 = memref.load %arg2[%c15_105] : memref<81xf32, #tpu.memory_space<smem>>
    %359 = vector.broadcast %358 : f32 to vector<8x256xf32>
    %360 = arith.mulf %359, %357 : vector<8x256xf32>
    %361 = arith.addf %343, %360 : vector<8x256xf32>
    %c42 = arith.constant 42 : index
    %362 = memref.load %arg2[%c42] : memref<81xf32, #tpu.memory_space<smem>>
    %363 = vector.broadcast %362 : f32 to vector<8x256xf32>
    %364 = arith.mulf %363, %357 : vector<8x256xf32>
    %365 = arith.addf %347, %364 : vector<8x256xf32>
    %c69 = arith.constant 69 : index
    %366 = memref.load %arg2[%c69] : memref<81xf32, #tpu.memory_space<smem>>
    %367 = vector.broadcast %366 : f32 to vector<8x256xf32>
    %368 = arith.mulf %367, %357 : vector<8x256xf32>
    %369 = arith.addf %351, %368 : vector<8x256xf32>
    %c16_106 = arith.constant 16 : index
    %370 = memref.load %arg2[%c16_106] : memref<81xf32, #tpu.memory_space<smem>>
    %371 = vector.broadcast %370 : f32 to vector<8x256xf32>
    %372 = arith.mulf %371, %354 : vector<8x256xf32>
    %373 = arith.addf %361, %372 : vector<8x256xf32>
    %c43 = arith.constant 43 : index
    %374 = memref.load %arg2[%c43] : memref<81xf32, #tpu.memory_space<smem>>
    %375 = vector.broadcast %374 : f32 to vector<8x256xf32>
    %376 = arith.mulf %375, %354 : vector<8x256xf32>
    %377 = arith.addf %365, %376 : vector<8x256xf32>
    %c70 = arith.constant 70 : index
    %378 = memref.load %arg2[%c70] : memref<81xf32, #tpu.memory_space<smem>>
    %379 = vector.broadcast %378 : f32 to vector<8x256xf32>
    %380 = arith.mulf %379, %354 : vector<8x256xf32>
    %381 = arith.addf %369, %380 : vector<8x256xf32>
    %c255_i32_107 = arith.constant 255 : i32
    %382 = tpu.dynamic_rotate %354 by %c255_i32_107 dim 1 : vector<8x256xf32>, i32 -> vector<8x256xf32>
    %cst_108 = arith.constant 0.000000e+00 : f32
    %383 = vector.broadcast %cst_108 : f32 to vector<8x256xf32>
    %384 = arith.select %24, %382, %383 : vector<8x256xi1>, vector<8x256xf32>
    %c17_109 = arith.constant 17 : index
    %385 = memref.load %arg2[%c17_109] : memref<81xf32, #tpu.memory_space<smem>>
    %386 = vector.broadcast %385 : f32 to vector<8x256xf32>
    %387 = arith.mulf %386, %384 : vector<8x256xf32>
    %388 = arith.addf %373, %387 : vector<8x256xf32>
    %c44 = arith.constant 44 : index
    %389 = memref.load %arg2[%c44] : memref<81xf32, #tpu.memory_space<smem>>
    %390 = vector.broadcast %389 : f32 to vector<8x256xf32>
    %391 = arith.mulf %390, %384 : vector<8x256xf32>
    %392 = arith.addf %377, %391 : vector<8x256xf32>
    %c71 = arith.constant 71 : index
    %393 = memref.load %arg2[%c71] : memref<81xf32, #tpu.memory_space<smem>>
    %394 = vector.broadcast %393 : f32 to vector<8x256xf32>
    %395 = arith.mulf %394, %384 : vector<8x256xf32>
    %396 = arith.addf %381, %395 : vector<8x256xf32>
    %c16_i32_110 = arith.constant 16 : i32
    %397 = tpu.dynamic_rotate %129 by %c16_i32_110 dim 1 : vector<8x256xf32>, i32 -> vector<8x256xf32>
    %cst_111 = arith.constant 0.000000e+00 : f32
    %398 = vector.broadcast %cst_111 : f32 to vector<8x256xf32>
    %399 = arith.select %18, %397, %398 : vector<8x256xi1>, vector<8x256xf32>
    %c1_i32_112 = arith.constant 1 : i32
    %400 = tpu.dynamic_rotate %399 by %c1_i32_112 dim 1 : vector<8x256xf32>, i32 -> vector<8x256xf32>
    %cst_113 = arith.constant 0.000000e+00 : f32
    %401 = vector.broadcast %cst_113 : f32 to vector<8x256xf32>
    %402 = arith.select %22, %400, %401 : vector<8x256xi1>, vector<8x256xf32>
    %c18 = arith.constant 18 : index
    %403 = memref.load %arg2[%c18] : memref<81xf32, #tpu.memory_space<smem>>
    %404 = vector.broadcast %403 : f32 to vector<8x256xf32>
    %405 = arith.mulf %404, %402 : vector<8x256xf32>
    %406 = arith.addf %388, %405 : vector<8x256xf32>
    %c45 = arith.constant 45 : index
    %407 = memref.load %arg2[%c45] : memref<81xf32, #tpu.memory_space<smem>>
    %408 = vector.broadcast %407 : f32 to vector<8x256xf32>
    %409 = arith.mulf %408, %402 : vector<8x256xf32>
    %410 = arith.addf %392, %409 : vector<8x256xf32>
    %c72 = arith.constant 72 : index
    %411 = memref.load %arg2[%c72] : memref<81xf32, #tpu.memory_space<smem>>
    %412 = vector.broadcast %411 : f32 to vector<8x256xf32>
    %413 = arith.mulf %412, %402 : vector<8x256xf32>
    %414 = arith.addf %396, %413 : vector<8x256xf32>
    %c19 = arith.constant 19 : index
    %415 = memref.load %arg2[%c19] : memref<81xf32, #tpu.memory_space<smem>>
    %416 = vector.broadcast %415 : f32 to vector<8x256xf32>
    %417 = arith.mulf %416, %399 : vector<8x256xf32>
    %418 = arith.addf %406, %417 : vector<8x256xf32>
    %c46 = arith.constant 46 : index
    %419 = memref.load %arg2[%c46] : memref<81xf32, #tpu.memory_space<smem>>
    %420 = vector.broadcast %419 : f32 to vector<8x256xf32>
    %421 = arith.mulf %420, %399 : vector<8x256xf32>
    %422 = arith.addf %410, %421 : vector<8x256xf32>
    %c73 = arith.constant 73 : index
    %423 = memref.load %arg2[%c73] : memref<81xf32, #tpu.memory_space<smem>>
    %424 = vector.broadcast %423 : f32 to vector<8x256xf32>
    %425 = arith.mulf %424, %399 : vector<8x256xf32>
    %426 = arith.addf %414, %425 : vector<8x256xf32>
    %c255_i32_114 = arith.constant 255 : i32
    %427 = tpu.dynamic_rotate %399 by %c255_i32_114 dim 1 : vector<8x256xf32>, i32 -> vector<8x256xf32>
    %cst_115 = arith.constant 0.000000e+00 : f32
    %428 = vector.broadcast %cst_115 : f32 to vector<8x256xf32>
    %429 = arith.select %24, %427, %428 : vector<8x256xi1>, vector<8x256xf32>
    %c20 = arith.constant 20 : index
    %430 = memref.load %arg2[%c20] : memref<81xf32, #tpu.memory_space<smem>>
    %431 = vector.broadcast %430 : f32 to vector<8x256xf32>
    %432 = arith.mulf %431, %429 : vector<8x256xf32>
    %433 = arith.addf %418, %432 : vector<8x256xf32>
    %c47 = arith.constant 47 : index
    %434 = memref.load %arg2[%c47] : memref<81xf32, #tpu.memory_space<smem>>
    %435 = vector.broadcast %434 : f32 to vector<8x256xf32>
    %436 = arith.mulf %435, %429 : vector<8x256xf32>
    %437 = arith.addf %422, %436 : vector<8x256xf32>
    %c74 = arith.constant 74 : index
    %438 = memref.load %arg2[%c74] : memref<81xf32, #tpu.memory_space<smem>>
    %439 = vector.broadcast %438 : f32 to vector<8x256xf32>
    %440 = arith.mulf %439, %429 : vector<8x256xf32>
    %441 = arith.addf %426, %440 : vector<8x256xf32>
    %c1_i32_116 = arith.constant 1 : i32
    %442 = tpu.dynamic_rotate %129 by %c1_i32_116 dim 1 : vector<8x256xf32>, i32 -> vector<8x256xf32>
    %cst_117 = arith.constant 0.000000e+00 : f32
    %443 = vector.broadcast %cst_117 : f32 to vector<8x256xf32>
    %444 = arith.select %22, %442, %443 : vector<8x256xi1>, vector<8x256xf32>
    %c21 = arith.constant 21 : index
    %445 = memref.load %arg2[%c21] : memref<81xf32, #tpu.memory_space<smem>>
    %446 = vector.broadcast %445 : f32 to vector<8x256xf32>
    %447 = arith.mulf %446, %444 : vector<8x256xf32>
    %448 = arith.addf %433, %447 : vector<8x256xf32>
    %c48 = arith.constant 48 : index
    %449 = memref.load %arg2[%c48] : memref<81xf32, #tpu.memory_space<smem>>
    %450 = vector.broadcast %449 : f32 to vector<8x256xf32>
    %451 = arith.mulf %450, %444 : vector<8x256xf32>
    %452 = arith.addf %437, %451 : vector<8x256xf32>
    %c75 = arith.constant 75 : index
    %453 = memref.load %arg2[%c75] : memref<81xf32, #tpu.memory_space<smem>>
    %454 = vector.broadcast %453 : f32 to vector<8x256xf32>
    %455 = arith.mulf %454, %444 : vector<8x256xf32>
    %456 = arith.addf %441, %455 : vector<8x256xf32>
    %c22 = arith.constant 22 : index
    %457 = memref.load %arg2[%c22] : memref<81xf32, #tpu.memory_space<smem>>
    %458 = vector.broadcast %457 : f32 to vector<8x256xf32>
    %459 = arith.mulf %458, %129 : vector<8x256xf32>
    %460 = arith.addf %448, %459 : vector<8x256xf32>
    %c49 = arith.constant 49 : index
    %461 = memref.load %arg2[%c49] : memref<81xf32, #tpu.memory_space<smem>>
    %462 = vector.broadcast %461 : f32 to vector<8x256xf32>
    %463 = arith.mulf %462, %129 : vector<8x256xf32>
    %464 = arith.addf %452, %463 : vector<8x256xf32>
    %c76 = arith.constant 76 : index
    %465 = memref.load %arg2[%c76] : memref<81xf32, #tpu.memory_space<smem>>
    %466 = vector.broadcast %465 : f32 to vector<8x256xf32>
    %467 = arith.mulf %466, %129 : vector<8x256xf32>
    %468 = arith.addf %456, %467 : vector<8x256xf32>
    %c255_i32_118 = arith.constant 255 : i32
    %469 = tpu.dynamic_rotate %129 by %c255_i32_118 dim 1 : vector<8x256xf32>, i32 -> vector<8x256xf32>
    %cst_119 = arith.constant 0.000000e+00 : f32
    %470 = vector.broadcast %cst_119 : f32 to vector<8x256xf32>
    %471 = arith.select %24, %469, %470 : vector<8x256xi1>, vector<8x256xf32>
    %c23 = arith.constant 23 : index
    %472 = memref.load %arg2[%c23] : memref<81xf32, #tpu.memory_space<smem>>
    %473 = vector.broadcast %472 : f32 to vector<8x256xf32>
    %474 = arith.mulf %473, %471 : vector<8x256xf32>
    %475 = arith.addf %460, %474 : vector<8x256xf32>
    %c50 = arith.constant 50 : index
    %476 = memref.load %arg2[%c50] : memref<81xf32, #tpu.memory_space<smem>>
    %477 = vector.broadcast %476 : f32 to vector<8x256xf32>
    %478 = arith.mulf %477, %471 : vector<8x256xf32>
    %479 = arith.addf %464, %478 : vector<8x256xf32>
    %c77 = arith.constant 77 : index
    %480 = memref.load %arg2[%c77] : memref<81xf32, #tpu.memory_space<smem>>
    %481 = vector.broadcast %480 : f32 to vector<8x256xf32>
    %482 = arith.mulf %481, %471 : vector<8x256xf32>
    %483 = arith.addf %468, %482 : vector<8x256xf32>
    %c240_i32_120 = arith.constant 240 : i32
    %484 = tpu.dynamic_rotate %129 by %c240_i32_120 dim 1 : vector<8x256xf32>, i32 -> vector<8x256xf32>
    %cst_121 = arith.constant 0.000000e+00 : f32
    %485 = vector.broadcast %cst_121 : f32 to vector<8x256xf32>
    %486 = arith.select %20, %484, %485 : vector<8x256xi1>, vector<8x256xf32>
    %c1_i32_122 = arith.constant 1 : i32
    %487 = tpu.dynamic_rotate %486 by %c1_i32_122 dim 1 : vector<8x256xf32>, i32 -> vector<8x256xf32>
    %cst_123 = arith.constant 0.000000e+00 : f32
    %488 = vector.broadcast %cst_123 : f32 to vector<8x256xf32>
    %489 = arith.select %22, %487, %488 : vector<8x256xi1>, vector<8x256xf32>
    %c24 = arith.constant 24 : index
    %490 = memref.load %arg2[%c24] : memref<81xf32, #tpu.memory_space<smem>>
    %491 = vector.broadcast %490 : f32 to vector<8x256xf32>
    %492 = arith.mulf %491, %489 : vector<8x256xf32>
    %493 = arith.addf %475, %492 : vector<8x256xf32>
    %c51 = arith.constant 51 : index
    %494 = memref.load %arg2[%c51] : memref<81xf32, #tpu.memory_space<smem>>
    %495 = vector.broadcast %494 : f32 to vector<8x256xf32>
    %496 = arith.mulf %495, %489 : vector<8x256xf32>
    %497 = arith.addf %479, %496 : vector<8x256xf32>
    %c78 = arith.constant 78 : index
    %498 = memref.load %arg2[%c78] : memref<81xf32, #tpu.memory_space<smem>>
    %499 = vector.broadcast %498 : f32 to vector<8x256xf32>
    %500 = arith.mulf %499, %489 : vector<8x256xf32>
    %501 = arith.addf %483, %500 : vector<8x256xf32>
    %c25 = arith.constant 25 : index
    %502 = memref.load %arg2[%c25] : memref<81xf32, #tpu.memory_space<smem>>
    %503 = vector.broadcast %502 : f32 to vector<8x256xf32>
    %504 = arith.mulf %503, %486 : vector<8x256xf32>
    %505 = arith.addf %493, %504 : vector<8x256xf32>
    %c52 = arith.constant 52 : index
    %506 = memref.load %arg2[%c52] : memref<81xf32, #tpu.memory_space<smem>>
    %507 = vector.broadcast %506 : f32 to vector<8x256xf32>
    %508 = arith.mulf %507, %486 : vector<8x256xf32>
    %509 = arith.addf %497, %508 : vector<8x256xf32>
    %c79 = arith.constant 79 : index
    %510 = memref.load %arg2[%c79] : memref<81xf32, #tpu.memory_space<smem>>
    %511 = vector.broadcast %510 : f32 to vector<8x256xf32>
    %512 = arith.mulf %511, %486 : vector<8x256xf32>
    %513 = arith.addf %501, %512 : vector<8x256xf32>
    %c255_i32_124 = arith.constant 255 : i32
    %514 = tpu.dynamic_rotate %486 by %c255_i32_124 dim 1 : vector<8x256xf32>, i32 -> vector<8x256xf32>
    %cst_125 = arith.constant 0.000000e+00 : f32
    %515 = vector.broadcast %cst_125 : f32 to vector<8x256xf32>
    %516 = arith.select %24, %514, %515 : vector<8x256xi1>, vector<8x256xf32>
    %c26 = arith.constant 26 : index
    %517 = memref.load %arg2[%c26] : memref<81xf32, #tpu.memory_space<smem>>
    %518 = vector.broadcast %517 : f32 to vector<8x256xf32>
    %519 = arith.mulf %518, %516 : vector<8x256xf32>
    %520 = arith.addf %505, %519 : vector<8x256xf32>
    %c53 = arith.constant 53 : index
    %521 = memref.load %arg2[%c53] : memref<81xf32, #tpu.memory_space<smem>>
    %522 = vector.broadcast %521 : f32 to vector<8x256xf32>
    %523 = arith.mulf %522, %516 : vector<8x256xf32>
    %524 = arith.addf %509, %523 : vector<8x256xf32>
    %c80 = arith.constant 80 : index
    %525 = memref.load %arg2[%c80] : memref<81xf32, #tpu.memory_space<smem>>
    %526 = vector.broadcast %525 : f32 to vector<8x256xf32>
    %527 = arith.mulf %526, %516 : vector<8x256xf32>
    %528 = arith.addf %513, %527 : vector<8x256xf32>
    %cst_126 = arith.constant 2.000000e+01 : f32
    %529 = vector.broadcast %cst_126 : f32 to vector<8x256xf32>
    %530 = arith.minimumf %520, %529 : vector<8x256xf32>
    %531 = math.exp %530 : vector<8x256xf32>
    %cst_127 = arith.constant 1.000000e+00 : f32
    %532 = vector.broadcast %cst_127 : f32 to vector<8x256xf32>
    %533 = arith.addf %532, %531 : vector<8x256xf32>
    %cst_128 = arith.constant 1.000000e+00 : f32
    %534 = vector.broadcast %cst_128 : f32 to vector<8x256xf32>
    %535 = arith.addf %534, %531 : vector<8x256xf32>
    %536 = arith.mulf %533, %535 : vector<8x256xf32>
    %cst_129 = arith.constant 1.000000e+00 : f32
    %537 = vector.broadcast %cst_129 : f32 to vector<8x256xf32>
    %538 = arith.subf %536, %537 : vector<8x256xf32>
    %cst_130 = arith.constant 1.000000e+00 : f32
    %539 = vector.broadcast %cst_130 : f32 to vector<8x256xf32>
    %540 = arith.addf %536, %539 : vector<8x256xf32>
    %541 = arith.divf %538, %540 : vector<8x256xf32>
    %542 = arith.mulf %520, %541 : vector<8x256xf32>
    %cst_131 = arith.constant 2.000000e+01 : f32
    %543 = vector.broadcast %cst_131 : f32 to vector<8x256xf32>
    %544 = arith.minimumf %524, %543 : vector<8x256xf32>
    %545 = math.exp %544 : vector<8x256xf32>
    %cst_132 = arith.constant 1.000000e+00 : f32
    %546 = vector.broadcast %cst_132 : f32 to vector<8x256xf32>
    %547 = arith.addf %546, %545 : vector<8x256xf32>
    %cst_133 = arith.constant 1.000000e+00 : f32
    %548 = vector.broadcast %cst_133 : f32 to vector<8x256xf32>
    %549 = arith.addf %548, %545 : vector<8x256xf32>
    %550 = arith.mulf %547, %549 : vector<8x256xf32>
    %cst_134 = arith.constant 1.000000e+00 : f32
    %551 = vector.broadcast %cst_134 : f32 to vector<8x256xf32>
    %552 = arith.subf %550, %551 : vector<8x256xf32>
    %cst_135 = arith.constant 1.000000e+00 : f32
    %553 = vector.broadcast %cst_135 : f32 to vector<8x256xf32>
    %554 = arith.addf %550, %553 : vector<8x256xf32>
    %555 = arith.divf %552, %554 : vector<8x256xf32>
    %556 = arith.mulf %524, %555 : vector<8x256xf32>
    %cst_136 = arith.constant 2.000000e+01 : f32
    %557 = vector.broadcast %cst_136 : f32 to vector<8x256xf32>
    %558 = arith.minimumf %528, %557 : vector<8x256xf32>
    %559 = math.exp %558 : vector<8x256xf32>
    %cst_137 = arith.constant 1.000000e+00 : f32
    %560 = vector.broadcast %cst_137 : f32 to vector<8x256xf32>
    %561 = arith.addf %560, %559 : vector<8x256xf32>
    %cst_138 = arith.constant 1.000000e+00 : f32
    %562 = vector.broadcast %cst_138 : f32 to vector<8x256xf32>
    %563 = arith.addf %562, %559 : vector<8x256xf32>
    %564 = arith.mulf %561, %563 : vector<8x256xf32>
    %cst_139 = arith.constant 1.000000e+00 : f32
    %565 = vector.broadcast %cst_139 : f32 to vector<8x256xf32>
    %566 = arith.subf %564, %565 : vector<8x256xf32>
    %cst_140 = arith.constant 1.000000e+00 : f32
    %567 = vector.broadcast %cst_140 : f32 to vector<8x256xf32>
    %568 = arith.addf %564, %567 : vector<8x256xf32>
    %569 = arith.divf %566, %568 : vector<8x256xf32>
    %570 = arith.mulf %528, %569 : vector<8x256xf32>
    %571 = math.tanh %59 : vector<8x256xf32>
    %572 = math.tanh %94 : vector<8x256xf32>
    %573 = math.tanh %129 : vector<8x256xf32>
    %574 = math.tanh %542 : vector<8x256xf32>
    %575 = math.tanh %556 : vector<8x256xf32>
    %576 = math.tanh %570 : vector<8x256xf32>
    %c0_141 = arith.constant 0 : index
    %577 = memref.load %arg3[%c0_141] : memref<18xf32, #tpu.memory_space<smem>>
    %578 = vector.broadcast %577 : f32 to vector<8x256xf32>
    %579 = arith.mulf %578, %571 : vector<8x256xf32>
    %c1_142 = arith.constant 1 : index
    %580 = memref.load %arg3[%c1_142] : memref<18xf32, #tpu.memory_space<smem>>
    %581 = vector.broadcast %580 : f32 to vector<8x256xf32>
    %582 = arith.mulf %581, %572 : vector<8x256xf32>
    %583 = arith.addf %579, %582 : vector<8x256xf32>
    %c2_143 = arith.constant 2 : index
    %584 = memref.load %arg3[%c2_143] : memref<18xf32, #tpu.memory_space<smem>>
    %585 = vector.broadcast %584 : f32 to vector<8x256xf32>
    %586 = arith.mulf %585, %573 : vector<8x256xf32>
    %587 = arith.addf %583, %586 : vector<8x256xf32>
    %c3_144 = arith.constant 3 : index
    %588 = memref.load %arg3[%c3_144] : memref<18xf32, #tpu.memory_space<smem>>
    %589 = vector.broadcast %588 : f32 to vector<8x256xf32>
    %590 = arith.mulf %589, %574 : vector<8x256xf32>
    %591 = arith.addf %587, %590 : vector<8x256xf32>
    %c4_145 = arith.constant 4 : index
    %592 = memref.load %arg3[%c4_145] : memref<18xf32, #tpu.memory_space<smem>>
    %593 = vector.broadcast %592 : f32 to vector<8x256xf32>
    %594 = arith.mulf %593, %575 : vector<8x256xf32>
    %595 = arith.addf %591, %594 : vector<8x256xf32>
    %c5_146 = arith.constant 5 : index
    %596 = memref.load %arg3[%c5_146] : memref<18xf32, #tpu.memory_space<smem>>
    %597 = vector.broadcast %596 : f32 to vector<8x256xf32>
    %598 = arith.mulf %597, %576 : vector<8x256xf32>
    %599 = arith.addf %595, %598 : vector<8x256xf32>
    %600 = arith.mulf %599, %59 : vector<8x256xf32>
    %c0_147 = arith.constant 0 : index
    %c0_148 = arith.constant 0 : index
    %c0_149 = arith.constant 0 : index
    %601 = vector.load %arg5[%c0_147, %c0_148, %c0_149] : memref<3x8x256xf32, #tpu.memory_space<vmem>>, vector<1x8x256xf32>
    %602 = vector.shape_cast %601 : vector<1x8x256xf32> to vector<8x256xf32>
    %603 = vector.shape_cast %600 : vector<8x256xf32> to vector<1x8x256xf32>
    tpu.vector_store %arg5[%c0_147, %c0_148, %c0_149], %603 {strides = array<i32>} : memref<3x8x256xf32, #tpu.memory_space<vmem>>, vector<1x8x256xf32>,
    %c6_150 = arith.constant 6 : index
    %604 = memref.load %arg3[%c6_150] : memref<18xf32, #tpu.memory_space<smem>>
    %605 = vector.broadcast %604 : f32 to vector<8x256xf32>
    %606 = arith.mulf %605, %571 : vector<8x256xf32>
    %c7_151 = arith.constant 7 : index
    %607 = memref.load %arg3[%c7_151] : memref<18xf32, #tpu.memory_space<smem>>
    %608 = vector.broadcast %607 : f32 to vector<8x256xf32>
    %609 = arith.mulf %608, %572 : vector<8x256xf32>
    %610 = arith.addf %606, %609 : vector<8x256xf32>
    %c8_152 = arith.constant 8 : index
    %611 = memref.load %arg3[%c8_152] : memref<18xf32, #tpu.memory_space<smem>>
    %612 = vector.broadcast %611 : f32 to vector<8x256xf32>
    %613 = arith.mulf %612, %573 : vector<8x256xf32>
    %614 = arith.addf %610, %613 : vector<8x256xf32>
    %c9_153 = arith.constant 9 : index
    %615 = memref.load %arg3[%c9_153] : memref<18xf32, #tpu.memory_space<smem>>
    %616 = vector.broadcast %615 : f32 to vector<8x256xf32>
    %617 = arith.mulf %616, %574 : vector<8x256xf32>
    %618 = arith.addf %614, %617 : vector<8x256xf32>
    %c10_154 = arith.constant 10 : index
    %619 = memref.load %arg3[%c10_154] : memref<18xf32, #tpu.memory_space<smem>>
    %620 = vector.broadcast %619 : f32 to vector<8x256xf32>
    %621 = arith.mulf %620, %575 : vector<8x256xf32>
    %622 = arith.addf %618, %621 : vector<8x256xf32>
    %c11_155 = arith.constant 11 : index
    %623 = memref.load %arg3[%c11_155] : memref<18xf32, #tpu.memory_space<smem>>
    %624 = vector.broadcast %623 : f32 to vector<8x256xf32>
    %625 = arith.mulf %624, %576 : vector<8x256xf32>
    %626 = arith.addf %622, %625 : vector<8x256xf32>
    %627 = arith.mulf %626, %94 : vector<8x256xf32>
    %c1_156 = arith.constant 1 : index
    %c0_157 = arith.constant 0 : index
    %c0_158 = arith.constant 0 : index
    %628 = vector.load %arg5[%c1_156, %c0_157, %c0_158] : memref<3x8x256xf32, #tpu.memory_space<vmem>>, vector<1x8x256xf32>
    %629 = vector.shape_cast %628 : vector<1x8x256xf32> to vector<8x256xf32>
    %630 = vector.shape_cast %627 : vector<8x256xf32> to vector<1x8x256xf32>
    tpu.vector_store %arg5[%c1_156, %c0_157, %c0_158], %630 {strides = array<i32>} : memref<3x8x256xf32, #tpu.memory_space<vmem>>, vector<1x8x256xf32>,
    %c12_159 = arith.constant 12 : index
    %631 = memref.load %arg3[%c12_159] : memref<18xf32, #tpu.memory_space<smem>>
    %632 = vector.broadcast %631 : f32 to vector<8x256xf32>
    %633 = arith.mulf %632, %571 : vector<8x256xf32>
    %c13_160 = arith.constant 13 : index
    %634 = memref.load %arg3[%c13_160] : memref<18xf32, #tpu.memory_space<smem>>
    %635 = vector.broadcast %634 : f32 to vector<8x256xf32>
    %636 = arith.mulf %635, %572 : vector<8x256xf32>
    %637 = arith.addf %633, %636 : vector<8x256xf32>
    %c14_161 = arith.constant 14 : index
    %638 = memref.load %arg3[%c14_161] : memref<18xf32, #tpu.memory_space<smem>>
    %639 = vector.broadcast %638 : f32 to vector<8x256xf32>
    %640 = arith.mulf %639, %573 : vector<8x256xf32>
    %641 = arith.addf %637, %640 : vector<8x256xf32>
    %c15_162 = arith.constant 15 : index
    %642 = memref.load %arg3[%c15_162] : memref<18xf32, #tpu.memory_space<smem>>
    %643 = vector.broadcast %642 : f32 to vector<8x256xf32>
    %644 = arith.mulf %643, %574 : vector<8x256xf32>
    %645 = arith.addf %641, %644 : vector<8x256xf32>
    %c16_163 = arith.constant 16 : index
    %646 = memref.load %arg3[%c16_163] : memref<18xf32, #tpu.memory_space<smem>>
    %647 = vector.broadcast %646 : f32 to vector<8x256xf32>
    %648 = arith.mulf %647, %575 : vector<8x256xf32>
    %649 = arith.addf %645, %648 : vector<8x256xf32>
    %c17_164 = arith.constant 17 : index
    %650 = memref.load %arg3[%c17_164] : memref<18xf32, #tpu.memory_space<smem>>
    %651 = vector.broadcast %650 : f32 to vector<8x256xf32>
    %652 = arith.mulf %651, %576 : vector<8x256xf32>
    %653 = arith.addf %649, %652 : vector<8x256xf32>
    %654 = arith.mulf %653, %129 : vector<8x256xf32>
    %c2_165 = arith.constant 2 : index
    %c0_166 = arith.constant 0 : index
    %c0_167 = arith.constant 0 : index
    %655 = vector.load %arg5[%c2_165, %c0_166, %c0_167] : memref<3x8x256xf32, #tpu.memory_space<vmem>>, vector<1x8x256xf32>
    %656 = vector.shape_cast %655 : vector<1x8x256xf32> to vector<8x256xf32>
    %657 = vector.shape_cast %654 : vector<8x256xf32> to vector<1x8x256xf32>
    tpu.vector_store %arg5[%c2_165, %c0_166, %c0_167], %657 {strides = array<i32>} : memref<3x8x256xf32, #tpu.memory_space<vmem>>, vector<1x8x256xf32>,
    return
  }
  func.func @transform_0(%arg0: i32) -> i32 {
    %c0_i32 = arith.constant 0 : i32
    %c0_i32_0 = arith.constant 0 : i32
    return %c0_i32 : i32
  }
  func.func @transform_1(%arg0: i32) -> i32 {
    %c0_i32 = arith.constant 0 : i32
    %c0_i32_0 = arith.constant 0 : i32
    return %c0_i32 : i32
  }
  func.func @transform_2(%arg0: i32) -> i32 {
    %c0_i32 = arith.constant 0 : i32
    %c0_i32_0 = arith.constant 0 : i32
    return %c0_i32 : i32
  }
  func.func @transform_3(%arg0: i32) -> (i32, i32, i32) {
    %c0_i32 = arith.constant 0 : i32
    %c0_i32_0 = arith.constant 0 : i32
    %c0_i32_1 = arith.constant 0 : i32
    return %c0_i32, %arg0, %c0_i32_0 : i32, i32, i32
  }
  func.func @transform_4(%arg0: i32) -> (i32, i32, i32) {
    %c0_i32 = arith.constant 0 : i32
    %c0_i32_0 = arith.constant 0 : i32
    %c0_i32_1 = arith.constant 0 : i32
    return %c0_i32, %arg0, %c0_i32_0 : i32, i32, i32
  }
}

</mosaic_0001>

<bundles_post_ra>
// kernel: tpu_custom_call.1
= control target key start
LH: loop header
LB: loop body
LE: loop exit
PB: predicated region body
PF: predicated region fallthrough
CT: control target
= control target key end

     0   :  { %s2836_s0 = inlined_call_operand.hbm [shape: f32[18], index: 0, kind: input, shape index: {}]   ;;  %s2837_s1 = inlined_call_operand.vmem [shape: f32[81], index: 1, kind: input, shape index: {}]   ;;  %s2838_s2 = inlined_call_operand.vmem [shape: f32[18], index: 2, kind: input, shape index: {}]   ;;  %s2839_s3 = inlined_call_operand.hbm [shape: f32[6,8,256], index: 3, kind: input, shape index: {}]   ;;  %s2840_s4 = inlined_call_operand.hbm [shape: f32[3,8,256], index: 4, kind: output, shape index: {}]  }
   0x1   :  { %2904 = sst [smem:[#allocation76_spill]] %s2840_s4 }
   0x2   :  { %9 = vsyncpa [#allocation5], 0 }
   0x3   :  { %10 = vsyncpa [#allocation6], 0 }
   0x4   :  { %11 = vsyncpa [#allocation9], 0 }
   0x5   :  { %12 = vsyncpa [#allocation3], 0 }
   0x6   :  { %13 = vsyncpa [#allocation4], 0  ;;  %s28_s17 = sshll.u32 %s2837_s1, 4  ;;  %s1289_s20 = scalar_lea.hbm %s2836_s0, 16  ;;  %s29_s17 = int_to_ptr.vmem [resolvable:$true] %s28_s17 }
   0x7   :  { %p1290_p0 = scmp.ne.s32.totalorder %s2836_s0, %s1289_s20  ;;  %p1293_p1 = scmp.lt.u32.totalorder %s1289_s20, %s2836_s0 }
   0x9   :  { %p1295_p2 = pnand %p1293_p1, %p1290_p0 }
   0xb   :  { %1298 = shalt.err (!%p1295_p2)
}
   0xc   :  { %s1377_s25 = smov [#allocation2]   ;;  %s1299_s1 = scalar_lea.vmem %s29_s17, 16 }
   0xd   :  { %21 = dma.hbm_to_smem %s2836_s0, 16, %s1377_s25, [#allocation5]  }
   0xe   :  { %p1300_p3 = scmp.ne.s32.totalorder %s29_s17, %s1299_s1  ;;  %p1304_p4 = scmp.lt.s32.totalorder %s29_s17, %s29_s17 }
   0xf   :  { %p1305_p5 = scmp.lt.s32.totalorder %s1299_s1, %s1299_s1 }
  0x11   :  { %p1306_p6 = por %p1305_p5, %p1304_p4 }
  0x13   :  { %p1307_p7 = pnand %p1306_p6, %p1300_p3 }
  0x15   :  { %1310 = shalt.err (!%p1307_p7)
}
  0x16   :  { %s1378_s28 = smov [#allocation7]   ;;  %s38_s5 = sshll.u32 %s2838_s2, 4  ;;  %s39_s5 = int_to_ptr.vmem [resolvable:$true] %s38_s5 }
  0x17   :  { %31 = dma.vmem_to_smem %s29_s17, 16, %s1378_s28, [#allocation6]  }
  0x18   :  { %s1311_s6 = scalar_lea.vmem %s39_s5, 16  ;;  %p1316_p9 = scmp.lt.s32.totalorder %s39_s5, %s39_s5 }
  0x19   :  { %p1312_p8 = scmp.ne.s32.totalorder %s39_s5, %s1311_s6  ;;  %p1317_p10 = scmp.lt.s32.totalorder %s1311_s6, %s1311_s6 }
  0x1b   :  { %p1318_p11 = por %p1317_p10, %p1316_p9 }
  0x1d   :  { %p1319_p12 = pnand %p1318_p11, %p1312_p8 }
  0x1f   :  { %1322 = shalt.err (!%p1319_p12)
}
  0x20   :  { %s1379_s0 = smov [#allocation8]   ;;  %s1380_s7 = smov [#allocation10]  }
  0x21   :  { %41 = dma.vmem_to_smem %s39_s5, 16, %s1379_s0, [#allocation9]  }
  0x22   :  { %s47_s8 = sshll.u32 %s1380_s7, 4  ;;  %s1323_s11 = scalar_lea.hbm %s2839_s3, 1536  ;;  %s48_s8 = int_to_ptr.vmem [resolvable:$true] %s47_s8 }
  0x23   :  { %p1324_p13 = scmp.ne.s32.totalorder %s2839_s3, %s1323_s11  ;;  %p1327_p0 = scmp.lt.u32.totalorder %s1323_s11, %s2839_s3 }
  0x25   :  { %p1329_p1 = pnand %p1327_p0, %p1324_p13 }
  0x27   :  { %1332 = shalt.err (!%p1329_p1)
}
  0x28   :  { %s1333_s15 = scalar_lea.vmem %s48_s8, 1536  ;;  %p1338_p3 = scmp.lt.s32.totalorder %s48_s8, %s48_s8 }
  0x29   :  { %p1334_p2 = scmp.ne.s32.totalorder %s48_s8, %s1333_s15  ;;  %p1339_p4 = scmp.lt.s32.totalorder %s1333_s15, %s1333_s15 }
  0x2b   :  { %p1340_p5 = por %p1339_p4, %p1338_p3 }
  0x2d   :  { %p1341_p6 = pnand %p1340_p5, %p1334_p2 }
  0x2f   :  { %1344 = shalt.err (!%p1341_p6)
}
  0x30   :  { %s2841_s16 = smov 256   ;;  %s2842_s17 = smov 16  }
  0x31   :  { %53 = dma.hbm_to_vmem [thread:$0]  %s2839_s3, 1536, %s48_s8, [#allocation3], %s2841_s16, %s2841_s16, %s2842_s17  }
  0x32   :  { %1367 = dma.done.wait [#allocation5], 16  }
  0x33   :  { %1368 = vsyncadd [#allocation5], 4294967280 }
  0x34   :  { %1369 = dma.done.wait [#allocation6], 16  }
  0x35   :  { %1370 = vsyncadd [#allocation6], 4294967280 }
  0x36   :  { %1371 = dma.done.wait [#allocation9], 16  }
  0x37   :  { %1372 = vsyncadd [#allocation9], 4294967280 }
  0x38   :  { %1373 = dma.done.wait [#allocation3], 1536  }
  0x39   :  { %1374 = vsyncadd [#allocation3], 4294965760 }
  0x3a   :  { %66 = sfence }
  0x3b   :  { %s1445_s20 = sld [smem:[#allocation2]]  ;;  %s1447_s21 = sld [smem:[#allocation2 + $0x1]]  ;;  %v1459_v0 = vld [vmem:[#allocation10] sm:$0xff]  ;;  %v1461_v1 = vld [vmem:[#allocation10 + $0x10] sm:$0xff]  ;;  %v1479_v8 = vld [vmem:[#allocation10 + $0x8] sm:$0xff] }
  0x3c   :  { %s1449_s22 = sld [smem:[#allocation2 + $0x2]]  ;;  %s1451_s23 = sld [smem:[#allocation2 + $0x3]]  ;;  %v1465_v2 = vld [vmem:[#allocation10 + $0x20] sm:$0xff]  ;;  %v1467_v3 = vld [vmem:[#allocation10 + $0x30] sm:$0xff]  ;;  %v1487_v13 = vld [vmem:[#allocation10 + $0x18] sm:$0xff] }
  0x3d   :  { %s1453_s3 = sld [smem:[#allocation2 + $0x4]]  ;;  %s1455_s24 = sld [smem:[#allocation2 + $0x5]]  ;;  %v1475_v6 = vld [vmem:[#allocation10 + $0x40] sm:$0xff]  ;;  %v1477_v7 = vld [vmem:[#allocation10 + $0x50] sm:$0xff]  ;;  %v1489_v14 = vld [vmem:[#allocation10 + $0x28] sm:$0xff] }
  0x3e   :  { %s1457_s25 = sld [smem:[#allocation2 + $0x6]]  ;;  %s1463_s26 = sld [smem:[#allocation2 + $0x7]]  ;;  %v1491_v15 = vld [vmem:[#allocation10 + $0x38] sm:$0xff]  ;;  %v1498_v19 = vld [vmem:[#allocation10 + $0x48] sm:$0xff] }
  0x3f   :  { %s1469_s27 = sld [smem:[#allocation2 + $0x8]]  ;;  %s1471_s1 = sld [smem:[#allocation2 + $0x9]]  ;;  %v1510_v30 = vld [vmem:[#allocation10 + $0x58] sm:$0xff] }
  0x40   :  { %s1481_s28 = sld [smem:[#allocation2 + $0xa]]  ;;  %s1493_s29 = sld [smem:[#allocation2 + $0xb]] }
  0x41   :  { %v105_v4 = vstv %s1445_s20  ;;  %v112_v5 = vstv %s1447_s21  ;;  %s1507_s30 = sld [smem:[#allocation2 + $0xc]]  ;;  %s1514_s5 = sld [smem:[#allocation2 + $0xd]] }
  0x42   :  { %v106_v9 = vmul.f32 %v105_v4, %v1459_v0  ;;  %v113_v10 = vmul.f32 %v112_v5, %v1461_v1  ;;  %v121_v11 = vstv %s1449_s22  ;;  %v130_v12 = vstv %s1451_s23  ;;  %s1516_s6 = sld [smem:[#allocation2 + $0xe]]  ;;  %s1524_s0 = sld [smem:[#allocation2 + $0xf]] }
  0x43   :  { %v122_v16 = vmul.f32 %v121_v11, %v1465_v2  ;;  %v139_v17 = vstv %s1453_s3  ;;  %v148_v18 = vstv %s1455_s24  ;;  %v131_v21 = vmul.f32 %v130_v12, %v1467_v3  ;;  %s1526_s7 = sld [smem:[#allocation2 + $0x10]]  ;;  %s1533_s8 = sld [smem:[#allocation2 + $0x11]] }
  0x44   :  { %v115_v20 = vadd.f32 %v113_v10, %v106_v9  ;;  %v140_v22 = vmul.f32 %v139_v17, %v1475_v6  ;;  %v107_v23 = vmul.f32 %v105_v4, %v1479_v8  ;;  %v149_v24 = vmul.f32 %v148_v18, %v1477_v7  ;;  %s1383_s9 = smov 112   ;;  %s1384_s10 = smov 1  }
  0x45   :  { %v114_v25 = vmul.f32 %v112_v5, %v1487_v13  ;;  %v123_v26 = vmul.f32 %v121_v11, %v1489_v14  ;;  %v132_v27 = vmul.f32 %v130_v12, %v1491_v15  ;;  %v141_v29 = vmul.f32 %v139_v17, %v1498_v19  ;;  %s1385_s11 = smov 127   ;;  %s1764_s12 = sld [smem:[#allocation7 + $0x7]] }
  0x46   :  { %v124_v28 = vadd.f32 %v122_v16, %v115_v20  ;;  %v154_v31 = vstv %s1457_s25  ;;  %v158_v32 = vstv %s1463_s26  ;;  %v164_v36 = vstv %s1469_s27  ;;  %s1766_s13 = sld [smem:[#allocation7 + $0x22]]  ;;  %s1768_s2 = sld [smem:[#allocation7 + $0x3d]] }
  0x47   :  { %v116_v33 = vadd.f32 %v114_v25, %v107_v23  ;;  %v156_v34 = vmul.f32 %v154_v31, %v1479_v8  ;;  %v160_v35 = vmul.f32 %v158_v32, %v1487_v13  ;;  %v166_v38 = vmul.f32 %v164_v36, %v1489_v14  ;;  %s1770_s14 = sld [smem:[#allocation7 + $0x1]]  ;;  %s1772_s15 = sld [smem:[#allocation7 + $0x1c]] }
  0x48   :  { %v133_v37 = vadd.f32 %v131_v21, %v124_v28  ;;  %v170_v39 = vstv %s1471_s1  ;;  %v176_v40 = vstv %s1481_s28  ;;  %v150_v42 = vmul.f32 %v148_v18, %v1510_v30  ;;  %s1774_s18 = sld [smem:[#allocation7 + $0x37]]  ;;  %s1776_s19 = sld [smem:[#allocation7 + $0xa]] }
  0x49   :  { %v125_v41 = vadd.f32 %v123_v26, %v116_v33  ;;  %v162_v43 = vadd.f32 %v160_v35, %v156_v34  ;;  %v172_v44 = vmul.f32 %v170_v39, %v1491_v15  ;;  %v182_v46 = vstv %s1493_s29  ;;  %s1778_s20 = sld [smem:[#allocation7 + $0x25]]  ;;  %s1780_s21 = sld [smem:[#allocation7 + $0x40]] }
  0x4a   :  { %v142_v45 = vadd.f32 %v140_v22, %v133_v37  ;;  %v155_v47 = vmul.f32 %v154_v31, %v1459_v0  ;;  %v159_v48 = vmul.f32 %v158_v32, %v1461_v1  ;;  %v178_v51 = vmul.f32 %v176_v40, %v1498_v19  ;;  %s1782_s22 = sld [smem:[#allocation7 + $0x10]]  ;;  %s1784_s23 = sld [smem:[#allocation7 + $0x2b]] }
  0x4b   :  { %v134_v49 = vadd.f32 %v132_v27, %v125_v41  ;;  %v168_v50 = vadd.f32 %v166_v38, %v162_v43  ;;  %v165_v52 = vmul.f32 %v164_v36, %v1465_v2  ;;  %v184_v54 = vmul.f32 %v182_v46, %v1510_v30  ;;  %s1786_s3 = sld [smem:[#allocation7 + $0x46]]  ;;  %s1788_s24 = sld [smem:[#allocation7 + $0x13]] }
  0x4c   :  { %v1537_v53 = vadd.f32 %v149_v24, %v142_v45  ;;  %v161_v55 = vadd.f32 %v159_v48, %v155_v47  ;;  %v171_v56 = vmul.f32 %v170_v39, %v1467_v3  ;;  %v177_v59 = vmul.f32 %v176_v40, %v1475_v6  ;;  %s1790_s25 = sld [smem:[#allocation7 + $0x2e]]  ;;  %s1792_s26 = sld [smem:[#allocation7 + $0x49]] }
  0x4d   :  { %v143_v57 = vadd.f32 %v141_v29, %v134_v49  ;;  %v174_v58 = vadd.f32 %v172_v44, %v168_v50  ;;  %v188_v60 = vstv %s1507_s30  ;;  %v192_v63 = vstv %s1514_s5  ;;  %s1794_s27 = sld [smem:[#allocation7 + $0x19]]  ;;  %s1796_s1 = sld [smem:[#allocation7 + $0x34]] }
  0x4e   :  { %2905 = vst [vmem:[#allocation17_spill] sm:$0xff] %v1537_v53  ;;  %372 = vrot.lane.b32.xlu1 %v1537_v53, %s1383_s9  ;;  %221 = vrot.lane.b32.xlu0 %v1537_v53, %s2842_s17  ;;  %v167_v61 = vadd.f32 %v165_v52, %v161_v55  ;;  %v190_v62 = vmul.f32 %v188_v60, %v1479_v8  ;;  %v198_v4 = vstv %s1516_s6  ;;  %v204_v17 = vstv %s1524_s0  ;;  %s1798_s28 = sld [smem:[#allocation7 + $0x4f]]  ;;  %s1800_s29 = sld [smem:[#allocation7 + $0x3]] }
  0x4f   :  { %v1550_v5 = vadd.f32 %v150_v42, %v143_v57  ;;  %v180_v9 = vadd.f32 %v178_v51, %v174_v58  ;;  %v194_v10 = vmul.f32 %v192_v63, %v1487_v13  ;;  %v200_v11 = vmul.f32 %v198_v4, %v1489_v14  ;;  %s1802_s30 = sld [smem:[#allocation7 + $0x1e]]  ;;  %s1804_s5 = sld [smem:[#allocation7 + $0x39]] }
  0x50   :  { %v173_v12 = vadd.f32 %v171_v56, %v167_v61  ;;  %v183_v16 = vmul.f32 %v182_v46, %v1477_v7  ;;  %v210_v18 = vstv %s1526_s7  ;;  %v206_v21 = vmul.f32 %v204_v17, %v1491_v15  ;;  %s1806_s6 = sld [smem:[#allocation7 + $0x5]]  ;;  %s1808_s0 = sld [smem:[#allocation7 + $0x20]] }
  0x51   :  { %2906 = vst [vmem:[#allocation18_spill] sm:$0xff] %v1550_v5  ;;  %v196_v20 = vadd.f32 %v194_v10, %v190_v62  ;;  %v1562_v8 = vadd.f32 %v184_v54, %v180_v9  ;;  %v216_v13 = vstv %s1533_s8  ;;  %v189_v14 = vmul.f32 %v188_v60, %v1459_v0  ;;  %s1810_s7 = sld [smem:[#allocation7 + $0x3b]]  ;;  %s1812_s8 = sld [smem:[#allocation7]] }
  0x52   :  { %374 = vrot.lane.b32.xlu1 %v1550_v5, %s1383_s9  ;;  %223 = vrot.lane.b32.xlu0 %v1550_v5, %s2842_s17  ;;  %v179_v22 = vadd.f32 %v177_v59, %v173_v12  ;;  %v212_v24 = vmul.f32 %v210_v18, %v1498_v19  ;;  %v193_v25 = vmul.f32 %v192_v63, %v1461_v1  ;;  %s1906_s16 = sld [smem:[#allocation7 + $0x21]] }
  0x53   :  { %2907 = vst [vmem:[#allocation19_spill] sm:$0xff] %v1562_v8  ;;  %v202_v23 = vadd.f32 %v200_v11, %v196_v20  ;;  %v199_v26 = vmul.f32 %v198_v4, %v1465_v2  ;;  %v205_v29 = vmul.f32 %v204_v17, %v1467_v3  ;;  %v218_v0 = vmul.f32 %v216_v13, %v1510_v30  ;;  %s1926_s4 = sld [smem:[#allocation7 + $0x9]] }
  0x54   :  { %v1569_v15 = vadd.f32 %v183_v16, %v179_v22  ;;  %v195_v28 = vadd.f32 %v193_v25, %v189_v14  ;;  %v211_v1 = vmul.f32 %v210_v18, %v1475_v6  ;;  %v217_v2 = vmul.f32 %v216_v13, %v1477_v7 }
  0x55   :  { %v208_v27 = vadd.f32 %v206_v21, %v202_v23  ;;  %v67_v6 = vlaneseq  ;;  %v408_v23 = vstv %s1764_s12  ;;  %v420_v25 = vstv %s1768_s2  ;;  %s1836_s12 = sld [smem:[#allocation7 + $0x1d]]  ;;  %s1844_s2 = sld [smem:[#allocation7 + $0x4]] }
  0x56   :  { %2908 = vst [vmem:[#allocation20_spill] sm:$0xff] %v1569_v15  ;;  %453 = vrot.lane.b32.xlu1 %v1562_v8, %s2842_s17  ;;  %451 = vrot.lane.b32.xlu0 %v1569_v15, %s2842_s17  ;;  %v201_v19 = vadd.f32 %v199_v26, %v195_v28  ;;  %2915 = sst [smem:[#allocation23_spill]] %s1808_s0  ;;  %v258_v26 = vstv %s1770_s14  ;;  %v270_v28 = vstv %s1774_s18  ;;  %s1846_s14 = sld [smem:[#allocation7 + $0x1f]] }
  0x57   :  { %v214_v31 = vadd.f32 %v212_v24, %v208_v27  ;;  %v1603_v7 = vand.u32 127, %v67_v6  ;;  %2916 = sst [smem:[#allocation24_spill]] %s1810_s7  ;;  %v414_v24 = vstv %s1766_s13  ;;  %v264_v27 = vstv %s1772_s15  ;;  %s1838_s13 = sld [smem:[#allocation7 + $0x38]] }
  0x58   :  { %v207_v32 = vadd.f32 %v205_v29, %v201_v19  ;;  %2917 = sst [smem:[#allocation25_spill]] %s1812_s8  ;;  %v486_v29 = vstv %s1776_s19  ;;  %v634_v19 = vstv %s1782_s22  ;;  %v724_v6 = vstv %s1792_s26  ;;  %s1852_s15 = sld [smem:[#allocation7 + $0xc]] }
  0x59   :  { %v1583_v3 = vadd.f32 %v218_v0, %v214_v31  ;;  %vm376_vm0 = vcmp.lt.s32.totalorder %v1603_v7, 112  ;;  %vm225_vm1 = vcmp.lt.s32.totalorder %v1603_v7, 16  ;;  %vm94_vm2 = vcmp.ge.s32.totalorder %v1603_v7, 16  ;;  %s1860_s18 = sld [smem:[#allocation7 + $0x27]]  ;;  %s1862_s19 = sld [smem:[#allocation7 + $0x42]] }
  0x5a   :  { %601 = vrot.lane.b32.xlu1 %v1562_v8, %s1383_s9  ;;  %599 = vrot.lane.b32.xlu0 %v1569_v15, %s1383_s9  ;;  %v213_v33 = vadd.f32 %v211_v1, %v207_v32  ;;  %v69_v49 = vadd.s32 128, %v1603_v7  ;;  %vm234_vm4 = vcmp.lt.s32.totalorder %v1603_v7, 1  ;;  %vm279_vm6 = vcmp.lt.s32.totalorder %v1603_v7, 127  ;;  %2929 = sst [smem:[#allocation35_spill]] %s1906_s16  ;;  %s1940_s8 = sld [smem:[#allocation7 + $0x8]] }
  0x5b   :  { %2909 = vst [vmem:[#allocation21_spill] sm:$0xff] %v1583_v3  ;;  %v492_v0 = vstv %s1778_s20  ;;  %v498_v31 = vstv %s1780_s21  ;;  %v640_v1 = vstv %s1784_s23  ;;  %v646_v32 = vstv %s1786_s3  ;;  %2921 = sst [smem:[#allocation29_spill]] %s1836_s12  ;;  %s1876_s20 = sld [smem:[#allocation7 + $0x3a]] }
  0x5c   :  { %v1585_v34 = vadd.f32 %v217_v2, %v213_v33  ;;  %v81_v50 = vand.u32 15, %v69_v49  ;;  %vm97_vm3 = vcmp.lt.s32.totalorder %v69_v49, 240  ;;  %v712_v2 = vstv %s1788_s24  ;;  %s1890_s21 = sld [smem:[#allocation7 + $0x6]]  ;;  %s1950_s7 = sld [smem:[#allocation7 + $0x23]] }
  0x5d   :  { %v718_v33 = vstv %s1790_s25  ;;  %2922 = sst [smem:[#allocation30_spill]] %s1838_s13  ;;  %s1952_s0 = sld [smem:[#allocation7 + $0x3e]] }
  0x5e   :  { %2910 = vst [vmem:[#allocation22_spill] sm:$0xff] %v1585_v34  ;;  %679 = vrot.lane.b32.xlu1 %v1583_v3, %s2842_s17  ;;  %677 = vrot.lane.b32.xlu0 %v1585_v34, %s2842_s17  ;;  %vm1650_vm5 = vcmp.ge.s32.totalorder %v81_v50, 1  ;;  %vm1676_vm7 = vcmp.le.s32.totalorder %v81_v50, 14  ;;  %2923 = sst [smem:[#allocation31_spill]] %s1852_s15  ;;  %s1908_s17 = sld [smem:[#allocation7 + $0x3c]] }
  0x5f   :  { %2924 = sst [smem:[#allocation32_spill]] %s1860_s18  ;;  %s1976_s22 = sld [smem:[#allocation7 + $0x26]] }
  0x60   :  { %2925 = sst [smem:[#allocation33_spill]] %s1862_s19  ;;  %s1986_s23 = sld [smem:[#allocation7 + $0x41]] }
  0x61   :  { %2935 = sst [smem:[#allocation39_spill]] %s1940_s8  ;;  %s2000_s3 = sld [smem:[#allocation7 + $0x29]] }
  0x62   :  { %827 = vrot.lane.b32.xlu1 %v1583_v3, %s1383_s9  ;;  %825 = vrot.lane.b32.xlu0 %v1585_v34, %s1383_s9  ;;  %s1814_s9 = sld [smem:[#allocation7 + $0x1b]]  ;;  %2937 = sst [smem:[#allocation41_spill]] %s1950_s7 }
  0x63   :  { %2926 = sst [smem:[#allocation34_spill]] %s1890_s21  ;;  %s2002_s19 = sld [smem:[#allocation7 + $0x44]] }
  0x64   :  { %2930 = sst [smem:[#allocation36_spill]] %s1908_s17  ;;  %s2041_s21 = sld [smem:[#allocation7 + $0x43]] }
  0x65   :  { %2938 = sst [smem:[#allocation42_spill]] %s1952_s0  ;;  %s2018_s18 = sld [smem:[#allocation7 + $0xd]] }
  0x66   :  { %304 = vrot.lane.b32.xlu1 %v1550_v5, %s1384_s10  ;;  %302 = vrot.lane.b32.xlu0 %v1537_v53, %s1384_s10  ;;  %s2043_s24 = sld [smem:[#allocation7 + $0xf]]  ;;  %s2060_s25 = sld [smem:[#allocation7 + $0x2a]] }
  0x67   :  { %s2062_s15 = sld [smem:[#allocation7 + $0x45]]  ;;  %s2076_s26 = sld [smem:[#allocation7 + $0x11]] }
  0x68   :  { %2918 = sst [smem:[#allocation26_spill]] %s1814_s9  ;;  %s1938_s9 = sld [smem:[#allocation7 + $0x3f]] }
  0x69   :  { %2944 = sst [smem:[#allocation48_spill]] %s2002_s19  ;;  %s2078_s13 = sld [smem:[#allocation7 + $0x2c]] }
  0x6a   :  { %348 = vrot.lane.b32.xlu1 %v1550_v5, %s1385_s11  ;;  %346 = vrot.lane.b32.xlu0 %v1537_v53, %s1385_s11  ;;  %s2097_s17 = sld [smem:[#allocation7 + $0x47]]  ;;  %s2112_s16 = sld [smem:[#allocation7 + $0x48]] }
  0x6b   :  { %s2118_s12 = sld [smem:[#allocation7 + $0x14]]  ;;  %s2964_s0 = sld [smem:[#allocation24_spill]] }
  0x6c   :  { %2950 = sst [smem:[#allocation54_spill]] %s2043_s24  ;;  %s2140_s7 = sld [smem:[#allocation7 + $0x16]] }
  0x6d   :  { %s2142_s8 = sld [smem:[#allocation7 + $0x31]]  ;;  %s2240_s24 = sld [smem:[#allocation7 + $0x4e]] }
  0x6e   :  { %2934 = sst [smem:[#allocation38_spill]] %s1938_s9  ;;  %s2194_s9 = sld [smem:[#allocation7 + $0x17]] }
  0x6f   :  { %s2242_s19 = sld [smem:[#allocation7 + $0x1a]] }
  0xc0   :  { %v373_v30 = vpop.permute.xlu1 %372  ;;  %v222_v35 = vpop.permute.xlu0 %221 }
  0xc4   :  { %v375_v36 = vpop.permute.xlu1 %374  ;;  %v224_v37 = vpop.permute.xlu0 %223 }
  0xc5   :  { %v1609_v38 = vsel %vm376_vm0, %v373_v30, %v375_v36  ;;  %v1613_v39 = vsel %vm225_vm1, %v222_v35, %v224_v37  ;;  %v227_v42 = vsel %vm225_vm1, %v224_v37, %v222_v35  ;;  %v378_v54 = vsel %vm376_vm0, %v375_v36, %v373_v30 }
  0xc6   :  { %381 = vrot.lane.b32.xlu0 %v1609_v38, %s1384_s10  ;;  %232 = vrot.lane.b32.xlu1 %v1613_v39, %s1384_s10  ;;  %v1632_v46 = vsel %vm94_vm2, %v227_v42, 0.0  ;;  %v1657_v57 = vsel %vm97_vm3, %v378_v54, 0.0  ;;  %v860_v30 = vstv %s1794_s27  ;;  %v866_v35 = vstv %s1796_s1  ;;  %s2099_s27 = sld [smem:[#allocation7 + $0x12]]  ;;  %s2110_s1 = sld [smem:[#allocation7 + $0x2d]] }
  0xc7   :  { %v872_v36 = vstv %s1798_s28  ;;  %v1871_v54 = vmul.f32 %v414_v24, %v1657_v57  ;;  %s2958_s28 = sld [smem:[#allocation23_spill]] }
  0xc8   :  { %v454_v40 = vpop.permute.xlu1 %453  ;;  %v452_v41 = vpop.permute.xlu0 %451 }
  0xc9   :  { %v1628_v43 = vsel %vm225_vm1, %v452_v41, %v454_v40  ;;  %v456_v59 = vsel %vm225_vm1, %v454_v40, %v452_v41  ;;  %v74_v40 = vand.u32 15, %v1603_v7 }
  0xca   :  { %425 = vrot.lane.b32.xlu0 %v1609_v38, %s1385_s11  ;;  %277 = vrot.lane.b32.xlu1 %v1613_v39, %s1385_s11  ;;  %v1684_v4 = vsel %vm94_vm2, %v456_v59, 0.0  ;;  %v1874_v59 = vmul.f32 %v420_v25, %v1609_v38 }
  0xcb   :  { %vm1895_vm8 = vcmp.ge.s32.totalorder %v74_v40, 1  ;;  %vm1922_vm9 = vcmp.le.s32.totalorder %v74_v40, 14 }
  0xcc   :  { %v602_v44 = vpop.permute.xlu1 %601  ;;  %v600_v45 = vpop.permute.xlu0 %599 }
  0xcd   :  { %v1710_v16 = vsel %vm376_vm0, %v600_v45, %v602_v44  ;;  %v604_v17 = vsel %vm376_vm0, %v602_v44, %v600_v45 }
  0xce   :  { %461 = vrot.lane.b32.xlu1 %v1628_v43, %s1384_s10  ;;  %230 = vrot.lane.b32.xlu0 %v1632_v46, %s1384_s10  ;;  %v1719_v18 = vsel %vm97_vm3, %v604_v17, 0.0  ;;  %v1885_v17 = vmul.f32 %v264_v27, %v1613_v39  ;;  %v1945_v40 = vmul.f32 %v634_v19, %v1710_v16  ;;  %v1972_v49 = vmul.f32 %v646_v32, %v1710_v16 }
  0xcf   :  { %v1967_v50 = vmul.f32 %v640_v1, %v1719_v18 }
  0xd0   :  { %v680_v47 = vpop.permute.xlu1 %679  ;;  %v678_v48 = vpop.permute.xlu0 %677  ;;  %2936 = vst [vmem:[#allocation40_spill] sm:$0xff] %v1945_v40  ;;  %2942 = vst [vmem:[#allocation46_spill] sm:$0xff] %v1972_v49  ;;  %v782_v49 = vstv %s2140_s7  ;;  %s2262_s7 = sld [smem:[#allocation7 + $0x35]] }
  0xd1   :  { %v1706_v12 = vsel %vm225_vm1, %v678_v48, %v680_v47  ;;  %v682_v20 = vsel %vm225_vm1, %v680_v47, %v678_v48  ;;  %v1855_v47 = vmul.f32 %v408_v23, %v1609_v38  ;;  %2941 = vst [vmem:[#allocation45_spill] sm:$0xff] %v1967_v50  ;;  %v788_v50 = vstv %s2142_s8  ;;  %s2985_s8 = sld [smem:[#allocation25_spill]] }
  0xd2   :  { %505 = vrot.lane.b32.xlu1 %v1628_v43, %s1385_s11  ;;  %275 = vrot.lane.b32.xlu0 %v1632_v46, %s1385_s11  ;;  %v1733_v21 = vsel %vm94_vm2, %v682_v20, 0.0  ;;  %v1888_v20 = vmul.f32 %v270_v28, %v1613_v39 }
  0xd3   :  { %v2030_v42 = vmul.f32 %v718_v33, %v1733_v21 }
  0xd4   :  { %v828_v51 = vpop.permute.xlu1 %827  ;;  %v826_v52 = vpop.permute.xlu0 %825 }
  0xd5   :  { %v830_v22 = vsel %vm376_vm0, %v828_v51, %v826_v52  ;;  %v1751_v13 = vsel %vm376_vm0, %v826_v52, %v828_v51  ;;  %v1865_v51 = vmul.f32 %v408_v23, %v1657_v57  ;;  %v1868_v52 = vmul.f32 %v414_v24, %v1609_v38  ;;  %2948 = vst [vmem:[#allocation52_spill] sm:$0xff] %v2030_v42 }
  0xd6   :  { %531 = vrot.lane.b32.xlu1 %v1562_v8, %s1384_s10  ;;  %529 = vrot.lane.b32.xlu0 %v1569_v15, %s1384_s10  ;;  %v1754_v14 = vsel %vm97_vm3, %v830_v22, 0.0  ;;  %v1893_v22 = vmul.f32 %v486_v29, %v1628_v43  ;;  %v1901_v23 = vmul.f32 %v258_v26, %v1632_v46  ;;  %v1904_v24 = vmul.f32 %v264_v27, %v1632_v46 }
  0xd7   :  { %v1920_v27 = vmul.f32 %v498_v31, %v1628_v43 }
  0xd8   :  { %v1654_v56 = vpop.permute.xlu1 %304  ;;  %v1659_v58 = vpop.permute.xlu0 %302 }
  0xd9   :  { %v306_v60 = vsel %vm234_vm4, %v1659_v58, %v1654_v56  ;;  %2931 = vst [vmem:[#allocation37_spill] sm:$0xff] %v1920_v27  ;;  %v307_v48 = vsel %vm234_vm4, %v1654_v56, %v1659_v58  ;;  %v2067_v58 = vmul.f32 %v860_v30, %v1751_v13 }
  0xda   :  { %573 = vrot.lane.b32.xlu0 %v1569_v15, %s1385_s11  ;;  %383 = vrot.lane.b32.xlu1 %v1657_v57, %s1384_s10  ;;  %v1673_v61 = vsel %vm1650_vm5, %v306_v60, 0.0  ;;  %v1879_v60 = vmul.f32 %v420_v25, %v1657_v57  ;;  %v1914_v25 = vmul.f32 %v492_v0, %v1684_v4 }
  0xdb   :  { %2952 = vst [vmem:[#allocation56_spill] sm:$0xff] %v2067_v58 }
  0xdc   :  { %v1680_v63 = vpop.permute.xlu1 %348  ;;  %v1686_v9 = vpop.permute.xlu0 %346 }
  0xdd   :  { %v351_v10 = vsel %vm279_vm6, %v1680_v63, %v1686_v9 }
  0xde   :  { %459 = vrot.lane.b32.xlu0 %v1684_v4, %s1384_s10  ;;  %427 = vrot.lane.b32.xlu1 %v1657_v57, %s1385_s11  ;;  %v1698_v11 = vsel %vm1676_vm7, %v351_v10, 0.0  ;;  %v1882_v10 = vmul.f32 %v258_v26, %v1613_v39  ;;  %v1911_v39 = vmul.f32 %v486_v29, %v1684_v4  ;;  %v1917_v26 = vmul.f32 %v492_v0, %v1628_v43 }
  0xdf   :  { %v1931_v29 = vmul.f32 %v498_v31, %v1684_v4  ;;  %v1934_v0 = vmul.f32 %v270_v28, %v1632_v46  ;;  %v335_v31 = vstv %s1846_s14  ;;  %v1957_v46 = vmul.f32 %v634_v19, %v1719_v18  ;;  %s1988_s14 = sld [smem:[#allocation7 + $0xe]] }
  0xe0   :  { %v1962_v28 = vmul.f32 %v640_v1, %v1710_v16  ;;  %v1981_v19 = vmul.f32 %v646_v32, %v1719_v18  ;;  %v1997_v44 = vmul.f32 %v335_v31, %v1537_v53  ;;  %v2007_v32 = vmul.f32 %v712_v2, %v1706_v12 }
  0xe1   :  { %2939 = vst [vmem:[#allocation43_spill] sm:$0xff] %v1957_v46  ;;  %v2012_v1 = vmul.f32 %v718_v33, %v1706_v12  ;;  %v2025_v43 = vmul.f32 %v712_v2, %v1733_v21  ;;  %v2048_v2 = vmul.f32 %v724_v6, %v1733_v21 }
  0xe2   :  { %503 = vrot.lane.b32.xlu0 %v1684_v4, %s1385_s11  ;;  %575 = vrot.lane.b32.xlu1 %v1562_v8, %s1385_s11  ;;  %v329_v4 = vstv %s1844_s2  ;;  %2940 = vst [vmem:[#allocation44_spill] sm:$0xff] %v1962_v28  ;;  %s1974_s2 = sld [smem:[#allocation7 + $0xb]]  ;;  %2943 = vst [vmem:[#allocation47_spill] sm:$0xff] %v1981_v19  ;;  %v2269_v28 = vmul.f32 %v788_v50, %v1583_v3 }
  0xe3   :  { %v1994_v45 = vmul.f32 %v329_v4, %v1550_v5  ;;  %2945 = vst [vmem:[#allocation49_spill] sm:$0xff] %v2007_v32  ;;  %2946 = vst [vmem:[#allocation50_spill] sm:$0xff] %v2012_v1 }
  0xe4   :  { %2947 = vst [vmem:[#allocation51_spill] sm:$0xff] %v2025_v43  ;;  %2951 = vst [vmem:[#allocation55_spill] sm:$0xff] %v2048_v2  ;;  %v568_v2 = vstv %s2041_s21  ;;  %s2226_s21 = sld [smem:[#allocation7 + $0x18]]  ;;  %v2257_v43 = vmul.f32 %v782_v49, %v1583_v3 }
  0xe5   :  { %v2220_v32 = vmul.f32 %v568_v2, %v1569_v15  ;;  %2987 = vst [vmem:[#allocation73_spill] sm:$0xff] %v2269_v28  ;;  %v2991_v28 = vstv %s2985_s8  ;;  %s3006_s8 = sld [smem:[#allocation31_spill]] }
  0xe6   :  { %607 = vrot.lane.b32.xlu0 %v1710_v16, %s1384_s10  ;;  %687 = vrot.lane.b32.xlu1 %v1706_v12, %s1384_s10  ;;  %2983 = vst [vmem:[#allocation71_spill] sm:$0xff] %v2257_v43 }
  0xe7   :  { %2979 = vst [vmem:[#allocation67_spill] sm:$0xff] %v2220_v32 }
  0xea   :  { %651 = vrot.lane.b32.xlu0 %v1710_v16, %s1385_s11  ;;  %609 = vrot.lane.b32.xlu1 %v1719_v18, %s1384_s10  ;;  %v1991_v16 = vmul.f32 %v329_v4, %v1537_v53  ;;  %v2015_v4 = vmul.f32 %v335_v31, %v1550_v5  ;;  %v2035_v31 = vmul.f32 %v724_v6, %v1706_v12 }
  0xeb   :  { %v2083_v6 = vmul.f32 %v860_v30, %v1754_v14  ;;  %v2104_v30 = vmul.f32 %v872_v36, %v1754_v14 }
  0xec   :  { %2949 = vst [vmem:[#allocation53_spill] sm:$0xff] %v2035_v31 }
  0xed   :  { %2954 = vst [vmem:[#allocation58_spill] sm:$0xff] %v2083_v6  ;;  %2957 = vst [vmem:[#allocation61_spill] sm:$0xff] %v2104_v30  ;;  %v2969_v6 = vstv %s2958_s28  ;;  %s2192_s28 = sld [smem:[#allocation7 + $0x4b]] }
  0xee   :  { %755 = vrot.lane.b32.xlu0 %v1585_v34, %s1384_s10  ;;  %653 = vrot.lane.b32.xlu1 %v1719_v18, %s1385_s11  ;;  %v341_v18 = vstv %s1876_s20  ;;  %s2020_s20 = sld [smem:[#allocation7 + $0x28]] }
  0xef   :  { %v2055_v33 = vmul.f32 %v341_v18, %v1537_v53  ;;  %v2058_v56 = vmul.f32 %v341_v18, %v1550_v5  ;;  %v2088_v18 = vmul.f32 %v866_v35, %v1754_v14 }
  0xf1   :  { %2955 = vst [vmem:[#allocation59_spill] sm:$0xff] %v2088_v18 }
  0xf2   :  { %685 = vrot.lane.b32.xlu0 %v1733_v21, %s1384_s10  ;;  %731 = vrot.lane.b32.xlu1 %v1706_v12, %s1385_s11  ;;  %v350_v12 = vsel %vm279_vm6, %v1686_v9, %v1680_v63  ;;  %v2072_v63 = vmul.f32 %v866_v35, %v1751_v13  ;;  %v2093_v9 = vmul.f32 %v872_v36, %v1751_v13 }
  0xf3   :  { %v352_v35 = vsel %vm1922_vm9, %v350_v12, 0.0  ;;  %2973 = sst [smem:[#allocation24_spill]] %s2192_s28 }
  0xf4   :  { %2953 = vst [vmem:[#allocation57_spill] sm:$0xff] %v2072_v63  ;;  %2956 = vst [vmem:[#allocation60_spill] sm:$0xff] %v2093_v9  ;;  %v3129_v62 = vld [vmem:[#allocation58_spill] sm:$0xff] }
  0xf6   :  { %729 = vrot.lane.b32.xlu0 %v1733_v21, %s1385_s11  ;;  %757 = vrot.lane.b32.xlu1 %v1583_v3, %s1384_s10  ;;  %v308_v21 = vsel %vm1895_vm8, %v307_v48, 0.0 }
  0xfa   :  { %799 = vrot.lane.b32.xlu0 %v1585_v34, %s1385_s11  ;;  %801 = vrot.lane.b32.xlu1 %v1583_v3, %s1385_s11 }
  0xfe   :  { %833 = vrot.lane.b32.xlu0 %v1751_v13, %s1384_s10  ;;  %835 = vrot.lane.b32.xlu1 %v1754_v14, %s1384_s10  ;;  %s1824_s10 = sld [smem:[#allocation7 + $0x36]] }
 0x102   :  { %877 = vrot.lane.b32.xlu0 %v1751_v13, %s1385_s11  ;;  %879 = vrot.lane.b32.xlu1 %v1754_v14, %s1385_s11  ;;  %s1830_s11 = sld [smem:[#allocation7 + $0x2]]  ;;  %v2960_v14 = vstv %s1800_s29  ;;  %v2962_v13 = vstv %s1802_s30  ;;  %s2164_s30 = sld [smem:[#allocation7 + $0x15]] }
 0x103   :  { %v2124_v36 = vmul.f32 %v2960_v14, %v308_v21  ;;  %v2961_v12 = vmov %v2960_v14  ;;  %v2133_v48 = vmul.f32 %v2962_v13, %v308_v21  ;;  %v2963_v5 = vmov %v2962_v13  ;;  %s2162_s29 = sld [smem:[#allocation7 + $0x4a]] }
 0x104   :  { %2919 = sst [smem:[#allocation27_spill]] %s1824_s10  ;;  %v2129_v41 = vmul.f32 %v2961_v12, %v1673_v61  ;;  %v2138_v53 = vmul.f32 %v2963_v5, %v1673_v61  ;;  %v2965_v14 = vstv %s1804_s5  ;;  %v2967_v13 = vstv %s1806_s6  ;;  %s2177_s5 = sld [smem:[#allocation7 + $0x30]] }
 0x105   :  { %s1928_s10 = sld [smem:[#allocation7 + $0x24]]  ;;  %v2146_v37 = vmul.f32 %v2965_v14, %v308_v21  ;;  %v2966_v12 = vmov %v2965_v14  ;;  %v2155_v9 = vmul.f32 %v2967_v13, %v352_v35  ;;  %v2968_v5 = vmov %v2967_v13 }
 0x106   :  { %v2151_v30 = vmul.f32 %v2966_v12, %v1673_v61  ;;  %v2160_v18 = vmul.f32 %v2968_v5, %v1698_v11  ;;  %v2168_v21 = vmul.f32 %v2969_v6, %v352_v35  ;;  %v2970_v14 = vmov %v2969_v6  ;;  %s2179_s6 = sld [smem:[#allocation7 + $0x4c]] }
 0x107   :  { %v2173_v61 = vmul.f32 %v2970_v14, %v1698_v11  ;;  %v556_v12 = vstv %s2018_s18  ;;  %v562_v13 = vstv %s2020_s20  ;;  %v2971_v5 = vstv %s2964_s0  ;;  %s2202_s0 = sld [smem:[#allocation7 + $0x32]]  ;;  %s2204_s18 = sld [smem:[#allocation7 + $0x4d]] }
 0x108   :  { %2920 = sst [smem:[#allocation28_spill]] %s1830_s11  ;;  %s2120_s11 = sld [smem:[#allocation7 + $0x2f]]  ;;  %v2183_v63 = vmul.f32 %v2971_v5, %v352_v35  ;;  %v2972_v58 = vmov %v2971_v5  ;;  %v2213_v42 = vmul.f32 %v562_v13, %v1569_v15  ;;  %v2217_v5 = vmul.f32 %v562_v13, %v1562_v8 }
 0x109   :  { %v2188_v31 = vmul.f32 %v2972_v58, %v1698_v11  ;;  %v2207_v11 = vmul.f32 %v556_v12, %v1569_v15  ;;  %v2210_v58 = vmul.f32 %v556_v12, %v1562_v8  ;;  %v2223_v6 = vmul.f32 %v568_v2, %v1562_v8  ;;  %s2228_s20 = sld [smem:[#allocation7 + $0x33]]  ;;  %s2988_s28 = sld [smem:[#allocation27_spill]] }
 0x10a   :  { %2977 = vst [vmem:[#allocation65_spill] sm:$0xff] %v2213_v42  ;;  %2978 = vst [vmem:[#allocation66_spill] sm:$0xff] %v2217_v5  ;;  %v2254_v8 = vmul.f32 %v782_v49, %v1585_v34  ;;  %v2260_v12 = vmul.f32 %v788_v50, %v1585_v34  ;;  %v2992_v5 = vmov %v2991_v28 }
 0x10b   :  { %2975 = vst [vmem:[#allocation63_spill] sm:$0xff] %v2207_v11  ;;  %2976 = vst [vmem:[#allocation64_spill] sm:$0xff] %v2210_v58 }
 0x10c   :  { %2980 = vst [vmem:[#allocation68_spill] sm:$0xff] %v2223_v6  ;;  %v794_v6 = vstv %s2179_s6  ;;  %2982 = vst [vmem:[#allocation70_spill] sm:$0xff] %v2254_v8  ;;  %s2986_s6 = sld [smem:[#allocation26_spill]] }
 0x10d   :  { %2974 = sst [smem:[#allocation62_spill]] %s2204_s18  ;;  %2984 = vst [vmem:[#allocation72_spill] sm:$0xff] %v2260_v12  ;;  %v2279_v43 = vmul.f32 %v794_v6, %v1585_v34  ;;  %v2282_v12 = vmul.f32 %v794_v6, %v1583_v3  ;;  %s2997_s18 = sld [smem:[#allocation28_spill]] }
 0x10e   :  { %2959 = sst [smem:[#allocation23_spill]] %s2120_s11 }
 0x10f   :  { %2981 = sst [smem:[#allocation69_spill]] %s2228_s20  ;;  %s2264_s11 = sld [smem:[#allocation7 + $0x50]]  ;;  %2989 = vst [vmem:[#allocation74_spill] sm:$0xff] %v2279_v43  ;;  %2990 = vst [vmem:[#allocation75_spill] sm:$0xff] %v2282_v12  ;;  %v2995_v43 = vstv %s2988_s28 }
 0x110   :  { %v2996_v6 = vmov %v2995_v43  ;;  %s2998_s20 = sld [smem:[#allocation29_spill]]  ;;  %s2999_s28 = sld [smem:[#allocation30_spill]] }
 0x116   :  { %v3004_v12 = vstv %s2999_s28  ;;  %s3016_s28 = sld [smem:[#allocation35_spill]] }
 0x138   :  { %v2196_v14 = vpop.permute.xlu0 %381  ;;  %v233_v1 = vpop.permute.xlu1 %232 }
 0x13c   :  { %v2234_v19 = vpop.permute.xlu0 %425  ;;  %v278_v2 = vpop.permute.xlu1 %277 }
 0x140   :  { %v2266_v40 = vpop.permute.xlu1 %461  ;;  %v231_v32 = vpop.permute.xlu0 %230 }
 0x141   :  { %v235_v35 = vsel %vm234_vm4, %v231_v32, %v233_v1  ;;  %v236_v46 = vsel %vm234_vm4, %v233_v1, %v231_v32  ;;  %v2993_v1 = vstv %s2986_s6  ;;  %s3015_s6 = sld [smem:[#allocation34_spill]] }
 0x142   :  { %v237_v50 = vsel %vm1895_vm8, %v236_v46, 0.0  ;;  %v238_v13 = vsel %vm1650_vm5, %v235_v35, 0.0  ;;  %v2994_v42 = vmov %v2993_v1 }
 0x143   :  { %v241_v8 = vmul.f32 %v2991_v28, %v237_v50  ;;  %v242_v58 = vmul.f32 %v2992_v5, %v238_v13  ;;  %v247_v32 = vmul.f32 %v2993_v1, %v237_v50  ;;  %v248_v34 = vmul.f32 %v2994_v42, %v238_v13 }
 0x144   :  { %v253_v11 = vmul.f32 %v2995_v43, %v237_v50  ;;  %v254_v3 = vmul.f32 %v2996_v6, %v238_v13  ;;  %v2302_v46 = vpop.permute.xlu1 %505  ;;  %v276_v35 = vpop.permute.xlu0 %275 }
 0x145   :  { %v261_v5 = vadd.f32 %v1901_v23, %v241_v8  ;;  %v262_v1 = vadd.f32 %v1882_v10, %v242_v58  ;;  %v267_v42 = vadd.f32 %v1904_v24, %v247_v32  ;;  %v268_v43 = vadd.f32 %v1885_v17, %v248_v34 }
 0x146   :  { %v273_v13 = vadd.f32 %v1934_v0, %v253_v11  ;;  %v274_v50 = vadd.f32 %v1888_v20, %v254_v3  ;;  %v280_v6 = vsel %vm279_vm6, %v276_v35, %v278_v2  ;;  %v281_v28 = vsel %vm279_vm6, %v278_v2, %v276_v35 }
 0x147   :  { %v282_v8 = vsel %vm1922_vm9, %v280_v6, 0.0  ;;  %v283_v10 = vsel %vm1676_vm7, %v281_v28, 0.0  ;;  %v3000_v34 = vstv %s2997_s18  ;;  %v3002_v11 = vstv %s2998_s20  ;;  %s3007_s18 = sld [smem:[#allocation32_spill]]  ;;  %s3008_s20 = sld [smem:[#allocation33_spill]] }
 0x148   :  { %v286_v17 = vmul.f32 %v3000_v34, %v282_v8  ;;  %v3001_v58 = vmov %v3000_v34  ;;  %v292_v3 = vmul.f32 %v3002_v11, %v282_v8  ;;  %v3003_v20 = vmov %v3002_v11  ;;  %v532_v49 = vpop.permute.xlu1 %531  ;;  %v530_v15 = vpop.permute.xlu0 %529 }
 0x149   :  { %v287_v0 = vmul.f32 %v3001_v58, %v283_v10  ;;  %v293_v32 = vmul.f32 %v3003_v20, %v283_v10  ;;  %v298_v2 = vmul.f32 %v3004_v12, %v282_v8  ;;  %v3005_v35 = vmov %v3004_v12 }
 0x14a   :  { %v299_v27 = vmul.f32 %v3005_v35, %v283_v10  ;;  %v533_v6 = vsel %vm234_vm4, %v530_v15, %v532_v49  ;;  %v534_v28 = vsel %vm234_vm4, %v532_v49, %v530_v15  ;;  %v288_v24 = vadd.f32 %v286_v17, %v261_v5 }
 0x14b   :  { %v289_v34 = vadd.f32 %v287_v0, %v262_v1  ;;  %v294_v58 = vadd.f32 %v292_v3, %v267_v42  ;;  %v295_v11 = vadd.f32 %v293_v32, %v268_v43  ;;  %v300_v20 = vadd.f32 %v298_v2, %v273_v13 }
 0x14c   :  { %v301_v23 = vadd.f32 %v299_v27, %v274_v50  ;;  %v535_v12 = vsel %vm1895_vm8, %v534_v28, 0.0  ;;  %v536_v8 = vsel %vm1650_vm5, %v533_v6, 0.0  ;;  %v314_v15 = vadd.f32 %v2124_v36, %v288_v24  ;;  %v2346_v42 = vpop.permute.xlu0 %573  ;;  %v384_v43 = vpop.permute.xlu1 %383 }
 0x14d   :  { %v315_v49 = vadd.f32 %v2129_v41, %v289_v34  ;;  %v320_v5 = vadd.f32 %v2133_v48, %v294_v58  ;;  %v321_v1 = vadd.f32 %v2138_v53, %v295_v11  ;;  %v326_v27 = vadd.f32 %v2146_v37, %v300_v20 }
 0x14e   :  { %v327_v13 = vadd.f32 %v2151_v30, %v301_v23  ;;  %v3009_v50 = vstv %s3006_s8  ;;  %v3011_v36 = vstv %s3007_s18  ;;  %v3013_v53 = vstv %s3008_s20  ;;  %s3017_s8 = sld [smem:[#allocation36_spill]]  ;;  %s3024_s18 = sld [smem:[#allocation38_spill]] }
 0x14f   :  { %v2352_v10 = vmul.f32 %v3009_v50, %v535_v12  ;;  %v3010_v17 = vmov %v3009_v50  ;;  %v2360_v24 = vmul.f32 %v3011_v36, %v535_v12  ;;  %v3012_v41 = vmov %v3011_v36  ;;  %s3031_s20 = sld [smem:[#allocation39_spill]] }
 0x150   :  { %v2356_v0 = vmul.f32 %v3010_v17, %v536_v8  ;;  %v2364_v48 = vmul.f32 %v3012_v41, %v536_v8  ;;  %v2368_v3 = vmul.f32 %v3013_v53, %v535_v12  ;;  %v3014_v32 = vmov %v3013_v53 }
 0x151   :  { %v2372_v2 = vmul.f32 %v3014_v32, %v536_v8  ;;  %v332_v37 = vadd.f32 %v1991_v16, %v314_v15  ;;  %v338_v30 = vadd.f32 %v1997_v44, %v320_v5  ;;  %v344_v23 = vadd.f32 %v2055_v33, %v326_v27  ;;  %v460_v16 = vpop.permute.xlu0 %459  ;;  %v428_v33 = vpop.permute.xlu1 %427 }
 0x152   :  { %v333_v35 = vadd.f32 %v1994_v45, %v315_v49  ;;  %v339_v6 = vadd.f32 %v2015_v4, %v321_v1  ;;  %v345_v28 = vadd.f32 %v2058_v56, %v327_v13  ;;  %v385_v34 = vsel %vm234_vm4, %v2196_v14, %v384_v43 }
 0x153   :  { %v386_v44 = vsel %vm234_vm4, %v384_v43, %v2196_v14  ;;  %v358_v45 = vadd.f32 %v2155_v9, %v332_v37  ;;  %v364_v4 = vadd.f32 %v2168_v21, %v338_v30  ;;  %v370_v58 = vadd.f32 %v2183_v63, %v344_v23 }
 0x154   :  { %v359_v56 = vadd.f32 %v2160_v18, %v333_v35  ;;  %v365_v11 = vadd.f32 %v2173_v61, %v339_v6  ;;  %v371_v20 = vadd.f32 %v2188_v31, %v345_v28  ;;  %v387_v12 = vsel %vm1895_vm8, %v386_v44, 0.0 }
 0x155   :  { %v388_v14 = vsel %vm1650_vm5, %v385_v34, 0.0  ;;  %v3018_v8 = vstv %s3015_s6  ;;  %v3020_v5 = vstv %s3016_s28  ;;  %v3022_v18 = vstv %s3017_s8  ;;  %v504_v53 = vpop.permute.xlu0 %503  ;;  %v576_v35 = vpop.permute.xlu1 %575  ;;  %s3032_s6 = sld [smem:[#allocation41_spill]] }
 0x156   :  { %v391_v15 = vmul.f32 %v3018_v8, %v387_v12  ;;  %v3019_v49 = vmov %v3018_v8  ;;  %v397_v21 = vmul.f32 %v3020_v5, %v387_v12  ;;  %v3021_v1 = vmov %v3020_v5 }
 0x157   :  { %v392_v9 = vmul.f32 %v3019_v49, %v388_v14  ;;  %v398_v63 = vmul.f32 %v3021_v1, %v388_v14  ;;  %v403_v61 = vmul.f32 %v3022_v18, %v387_v12  ;;  %v3023_v43 = vmov %v3022_v18 }
 0x158   :  { %v404_v31 = vmul.f32 %v3023_v43, %v388_v14  ;;  %v463_v27 = vsel %vm234_vm4, %v460_v16, %v2266_v40  ;;  %v464_v13 = vsel %vm234_vm4, %v2266_v40, %v460_v16  ;;  %v393_v50 = vadd.f32 %v391_v15, %v358_v45 }
 0x159   :  { %v394_v17 = vadd.f32 %v392_v9, %v359_v56  ;;  %v399_v36 = vadd.f32 %v397_v21, %v364_v4  ;;  %v400_v41 = vadd.f32 %v398_v63, %v365_v11  ;;  %v405_v32 = vadd.f32 %v403_v61, %v370_v58 }
 0x15a   :  { %v406_v37 = vadd.f32 %v404_v31, %v371_v20  ;;  %v465_v30 = vsel %vm1895_vm8, %v464_v13, 0.0  ;;  %v466_v23 = vsel %vm1650_vm5, %v463_v27, 0.0  ;;  %v3025_v6 = vstv %s1926_s4  ;;  %s3033_s4 = sld [smem:[#allocation42_spill]]  ;;  %v2466_v27 = vpop.permute.xlu1 %687 }
 0x15b   :  { %v469_v28 = vmul.f32 %v3025_v6, %v465_v30  ;;  %v3026_v34 = vmov %v3025_v6  ;;  %v3027_v40 = vstv %s1928_s10  ;;  %v3029_v4 = vstv %s3024_s18  ;;  %s3047_s10 = sld [smem:[#allocation48_spill]] }
 0x15c   :  { %v470_v44 = vmul.f32 %v3026_v34, %v466_v23  ;;  %v475_v16 = vmul.f32 %v3027_v40, %v465_v30  ;;  %v3028_v45 = vmov %v3027_v40  ;;  %v481_v11 = vmul.f32 %v3029_v4, %v465_v30 }
 0x15d   :  { %v476_v56 = vmul.f32 %v3028_v45, %v466_v23  ;;  %v3030_v12 = vmov %v3029_v4  ;;  %v411_v20 = vadd.f32 %v1855_v47, %v393_v50  ;;  %v417_v14 = vadd.f32 %v1868_v52, %v399_v36 }
 0x15e   :  { %v482_v58 = vmul.f32 %v3030_v12, %v466_v23  ;;  %v423_v8 = vadd.f32 %v1874_v59, %v405_v32  ;;  %v412_v15 = vadd.f32 %v1865_v51, %v394_v17  ;;  %v418_v49 = vadd.f32 %v1871_v54, %v400_v41 }
 0x15f   :  { %v424_v9 = vadd.f32 %v1879_v60, %v406_v37  ;;  %v429_v5 = vsel %vm279_vm6, %v2234_v19, %v428_v33  ;;  %v430_v47 = vsel %vm279_vm6, %v428_v33, %v2234_v19  ;;  %v507_v51 = vsel %vm279_vm6, %v504_v53, %v2302_v46  ;;  %v2456_v33 = vpop.permute.xlu0 %607 }
 0x160   :  { %v508_v52 = vsel %vm279_vm6, %v2302_v46, %v504_v53  ;;  %v431_v54 = vsel %vm1922_vm9, %v429_v5, 0.0  ;;  %v432_v59 = vsel %vm1676_vm7, %v430_v47, 0.0  ;;  %v509_v60 = vsel %vm1922_vm9, %v507_v51, 0.0 }
 0x161   :  { %v510_v19 = vsel %vm1676_vm7, %v508_v52, 0.0  ;;  %v3034_v21 = vstv %s3031_s20  ;;  %v3036_v18 = vstv %s3032_s6  ;;  %v3038_v13 = vstv %s3033_s4 }
 0x162   :  { %v435_v1 = vmul.f32 %v3034_v21, %v431_v54  ;;  %v3035_v63 = vmov %v3034_v21  ;;  %v441_v61 = vmul.f32 %v3036_v18, %v431_v54  ;;  %v3037_v43 = vmov %v3036_v18 }
 0x163   :  { %v436_v46 = vmul.f32 %v3035_v63, %v432_v59  ;;  %v442_v31 = vmul.f32 %v3037_v43, %v432_v59  ;;  %v447_v50 = vmul.f32 %v3038_v13, %v431_v54  ;;  %v3039_v17 = vmov %v3038_v13 }
 0x164   :  { %v448_v36 = vmul.f32 %v3039_v17, %v432_v59  ;;  %v3040_v41 = vstv %s1974_s2  ;;  %v437_v30 = vadd.f32 %v435_v1, %v411_v20  ;;  %v443_v6 = vadd.f32 %v441_v61, %v417_v14  ;;  %v652_v20 = vpop.permute.xlu0 %651  ;;  %s3056_s2 = sld [smem:[#allocation54_spill]] }
 0x165   :  { %v513_v53 = vmul.f32 %v3040_v41, %v509_v60  ;;  %v3041_v32 = vmov %v3040_v41  ;;  %v438_v23 = vadd.f32 %v436_v46, %v412_v15  ;;  %v444_v34 = vadd.f32 %v442_v31, %v418_v49 }
 0x166   :  { %v514_v37 = vmul.f32 %v3041_v32, %v510_v19  ;;  %v449_v40 = vadd.f32 %v447_v50, %v423_v8  ;;  %v450_v45 = vadd.f32 %v448_v36, %v424_v9  ;;  %v3042_v4 = vstv %s1976_s22  ;;  %v610_v9 = vpop.permute.xlu1 %609  ;;  %s2747_s22 = sld [smem:[#allocation8 + $0x7]] }
 0x167   :  { %v519_v12 = vmul.f32 %v3042_v4, %v509_v60  ;;  %v3043_v5 = vmov %v3042_v4  ;;  %v471_v51 = vadd.f32 %v469_v28, %v437_v30  ;;  %v472_v52 = vadd.f32 %v470_v44, %v438_v23  ;;  %v3046_v44 = vld [vmem:[#allocation37_spill] sm:$0xff] }
 0x168   :  { %v520_v47 = vmul.f32 %v3043_v5, %v510_v19  ;;  %v477_v54 = vadd.f32 %v475_v16, %v443_v6  ;;  %v478_v59 = vadd.f32 %v476_v56, %v444_v34  ;;  %v483_v21 = vadd.f32 %v481_v11, %v449_v40  ;;  %v2510_v32 = vpop.permute.xlu0 %755  ;;  %v3052_v23 = vld [vmem:[#allocation64_spill] sm:$0xff]  ;;  %v3053_v6 = vld [vmem:[#allocation66_spill] sm:$0xff] }
 0x169   :  { %v484_v63 = vadd.f32 %v482_v58, %v450_v45  ;;  %v3044_v18 = vstv %s1986_s23  ;;  %v489_v14 = vadd.f32 %v1911_v39, %v471_v51  ;;  %v490_v8 = vadd.f32 %v1893_v22, %v472_v52  ;;  %v3055_v45 = vld [vmem:[#allocation68_spill] sm:$0xff]  ;;  %s2758_s23 = sld [smem:[#allocation8 + $0xc]] }
 0x16a   :  { %v525_v43 = vmul.f32 %v3044_v18, %v509_v60  ;;  %v3045_v13 = vmov %v3044_v18  ;;  %v495_v15 = vadd.f32 %v1914_v25, %v477_v54  ;;  %v496_v49 = vadd.f32 %v1917_v26, %v478_v59  ;;  %v654_v34 = vpop.permute.xlu1 %653 }
 0x16b   :  { %v526_v17 = vmul.f32 %v3045_v13, %v510_v19  ;;  %v501_v28 = vadd.f32 %v1931_v29, %v483_v21  ;;  %v502_v16 = vadd.f32 %v3046_v44, %v484_v63  ;;  %v577_v56 = vsel %vm279_vm6, %v2346_v42, %v576_v35 }
 0x16c   :  { %v578_v39 = vsel %vm279_vm6, %v576_v35, %v2346_v42  ;;  %v515_v22 = vadd.f32 %v513_v53, %v489_v14  ;;  %v516_v11 = vadd.f32 %v514_v37, %v490_v8  ;;  %v521_v25 = vadd.f32 %v519_v12, %v495_v15 }
 0x16d   :  { %v522_v58 = vadd.f32 %v520_v47, %v496_v49  ;;  %v527_v26 = vadd.f32 %v525_v43, %v501_v28  ;;  %v528_v60 = vadd.f32 %v526_v17, %v502_v16  ;;  %v579_v29 = vsel %vm1922_vm9, %v577_v56, 0.0 }
 0x16e   :  { %v580_v19 = vsel %vm1676_vm7, %v578_v39, 0.0  ;;  %v541_v1 = vadd.f32 %v2352_v10, %v515_v22  ;;  %v542_v46 = vadd.f32 %v2356_v0, %v516_v11  ;;  %v547_v42 = vadd.f32 %v2360_v24, %v521_v25  ;;  %v3050_v10 = vld [vmem:[#allocation63_spill] sm:$0xff]  ;;  %v3051_v0 = vld [vmem:[#allocation65_spill] sm:$0xff] }
 0x16f   :  { %v548_v35 = vadd.f32 %v2364_v48, %v522_v58  ;;  %v553_v61 = vadd.f32 %v2368_v3, %v527_v26  ;;  %v554_v31 = vadd.f32 %v2372_v2, %v528_v60  ;;  %v3048_v50 = vstv %s1988_s14  ;;  %v3054_v3 = vld [vmem:[#allocation67_spill] sm:$0xff]  ;;  %v686_v58 = vpop.permute.xlu0 %685  ;;  %s2760_s14 = sld [smem:[#allocation8 + $0xd]] }
 0x170   :  { %v583_v36 = vmul.f32 %v3048_v50, %v579_v29  ;;  %v3049_v41 = vmov %v3048_v50  ;;  %v559_v37 = vadd.f32 %v3050_v10, %v541_v1  ;;  %v565_v30 = vadd.f32 %v3051_v0, %v547_v42  ;;  %v732_v1 = vpop.permute.xlu1 %731  ;;  %v3068_v10 = vld [vmem:[#allocation44_spill] sm:$0xff]  ;;  %v3069_v0 = vld [vmem:[#allocation43_spill] sm:$0xff] }
 0x171   :  { %v584_v53 = vmul.f32 %v3049_v41, %v580_v19  ;;  %v560_v24 = vadd.f32 %v3052_v23, %v542_v46  ;;  %v566_v48 = vadd.f32 %v3053_v6, %v548_v35  ;;  %v571_v40 = vadd.f32 %v3054_v3, %v553_v61  ;;  %v3070_v23 = vld [vmem:[#allocation45_spill] sm:$0xff]  ;;  %v3071_v6 = vld [vmem:[#allocation46_spill] sm:$0xff] }
 0x172   :  { %v572_v2 = vadd.f32 %v3055_v45, %v554_v31  ;;  %v3057_v4 = vstv %s2000_s3  ;;  %v585_v51 = vadd.f32 %v583_v36, %v559_v37  ;;  %v3059_v54 = vstv %s3047_s10  ;;  %s2766_s3 = sld [smem:[#allocation8 + $0x8]] }
 0x173   :  { %v589_v12 = vmul.f32 %v3057_v4, %v579_v29  ;;  %v3058_v5 = vmov %v3057_v4  ;;  %v586_v52 = vadd.f32 %v584_v53, %v560_v24  ;;  %v595_v59 = vmul.f32 %v3059_v54, %v579_v29 }
 0x174   :  { %v590_v47 = vmul.f32 %v3058_v5, %v580_v19  ;;  %v3060_v21 = vmov %v3059_v54  ;;  %v611_v13 = vsel %vm234_vm4, %v2456_v33, %v610_v9  ;;  %v612_v17 = vsel %vm234_vm4, %v610_v9, %v2456_v33 }
 0x175   :  { %v596_v63 = vmul.f32 %v3060_v21, %v580_v19  ;;  %v591_v18 = vadd.f32 %v589_v12, %v565_v30  ;;  %v597_v14 = vadd.f32 %v595_v59, %v571_v40  ;;  %v613_v15 = vsel %vm1895_vm8, %v612_v17, 0.0 }
 0x176   :  { %v592_v43 = vadd.f32 %v590_v47, %v566_v48  ;;  %v614_v49 = vsel %vm1650_vm5, %v611_v13, 0.0  ;;  %v3061_v28 = vstv %s3056_s2  ;;  %v3063_v39 = vstv %s2060_s25  ;;  %s2775_s25 = sld [smem:[#allocation8 + $0x3]] }
 0x177   :  { %v598_v8 = vadd.f32 %v596_v63, %v572_v2  ;;  %v617_v44 = vmul.f32 %v3061_v28, %v613_v15  ;;  %v3062_v16 = vmov %v3061_v28  ;;  %v623_v22 = vmul.f32 %v3063_v39, %v613_v15  ;;  %v730_v63 = vpop.permute.xlu0 %729 }
 0x178   :  { %v618_v56 = vmul.f32 %v3062_v16, %v614_v49  ;;  %v3064_v11 = vmov %v3063_v39  ;;  %v3065_v26 = vstv %s2062_s15  ;;  %v655_v29 = vsel %vm279_vm6, %v652_v20, %v654_v34  ;;  %s2743_s15 = sld [smem:[#allocation8 + $0x2]] }
 0x179   :  { %v624_v25 = vmul.f32 %v3064_v11, %v614_v49  ;;  %v629_v60 = vmul.f32 %v3065_v26, %v613_v15  ;;  %v3066_v33 = vmov %v3065_v26  ;;  %v656_v19 = vsel %vm279_vm6, %v654_v34, %v652_v20  ;;  %v3067_v20 = vld [vmem:[#allocation40_spill] sm:$0xff]  ;;  %v3072_v34 = vld [vmem:[#allocation47_spill] sm:$0xff] }
 0x17a   :  { %v630_v9 = vmul.f32 %v3066_v33, %v614_v49  ;;  %v619_v46 = vadd.f32 %v617_v44, %v585_v51  ;;  %v620_v42 = vadd.f32 %v618_v56, %v586_v52  ;;  %v625_v35 = vadd.f32 %v623_v22, %v591_v18 }
 0x17b   :  { %v626_v61 = vadd.f32 %v624_v25, %v592_v43  ;;  %v631_v31 = vadd.f32 %v629_v60, %v597_v14  ;;  %v657_v36 = vsel %vm1922_vm9, %v655_v29, 0.0  ;;  %v658_v41 = vsel %vm1676_vm7, %v656_v19, 0.0  ;;  %v758_v14 = vpop.permute.xlu1 %757 }
 0x17c   :  { %v632_v50 = vadd.f32 %v630_v9, %v598_v8  ;;  %v637_v53 = vadd.f32 %v3067_v20, %v619_v46  ;;  %v643_v37 = vadd.f32 %v3068_v10, %v625_v35  ;;  %v638_v30 = vadd.f32 %v3069_v0, %v620_v42  ;;  %v800_v0 = vpop.permute.xlu0 %799 }
 0x17d   :  { %v644_v24 = vadd.f32 %v3070_v23, %v626_v61  ;;  %v649_v48 = vadd.f32 %v3071_v6, %v631_v31  ;;  %v3073_v40 = vstv %s2076_s26  ;;  %v3075_v12 = vstv %s2078_s13  ;;  %v3088_v23 = vld [vmem:[#allocation51_spill] sm:$0xff]  ;;  %v3089_v6 = vld [vmem:[#allocation49_spill] sm:$0xff]  ;;  %s3118_s13 = sld [smem:[#allocation69_spill]]  ;;  %s2778_s26 = sld [smem:[#allocation8 + $0x4]] }
 0x17e   :  { %v650_v3 = vadd.f32 %v3072_v34, %v632_v50  ;;  %v661_v45 = vmul.f32 %v3073_v40, %v657_v36  ;;  %v3074_v2 = vmov %v3073_v40  ;;  %v667_v5 = vmul.f32 %v3075_v12, %v657_v36  ;;  %v3090_v34 = vld [vmem:[#allocation52_spill] sm:$0xff]  ;;  %v3091_v40 = vld [vmem:[#allocation50_spill] sm:$0xff] }
 0x17f   :  { %v662_v4 = vmul.f32 %v3074_v2, %v658_v41  ;;  %v3076_v47 = vmov %v3075_v12  ;;  %v3077_v52 = vstv %s2097_s17  ;;  %v689_v13 = vsel %vm234_vm4, %v686_v58, %v2466_v27  ;;  %s3085_s17 = sld [smem:[#allocation23_spill]]  ;;  %v3092_v2 = vld [vmem:[#allocation55_spill] sm:$0xff]  ;;  %v3093_v12 = vld [vmem:[#allocation53_spill] sm:$0xff] }
 0x180   :  { %v668_v51 = vmul.f32 %v3076_v47, %v658_v41  ;;  %v673_v54 = vmul.f32 %v3077_v52, %v657_v36  ;;  %v3078_v59 = vmov %v3077_v52  ;;  %v663_v18 = vadd.f32 %v661_v45, %v637_v53 }
 0x181   :  { %v674_v21 = vmul.f32 %v3078_v59, %v658_v41  ;;  %v664_v43 = vadd.f32 %v662_v4, %v638_v30  ;;  %v690_v17 = vsel %vm234_vm4, %v2466_v27, %v686_v58  ;;  %v669_v8 = vadd.f32 %v667_v5, %v643_v37  ;;  %v802_v30 = vpop.permute.xlu1 %801 }
 0x182   :  { %v670_v15 = vadd.f32 %v668_v51, %v644_v24  ;;  %v675_v49 = vadd.f32 %v673_v54, %v649_v48  ;;  %v691_v44 = vsel %vm1895_vm8, %v690_v17, 0.0  ;;  %v692_v16 = vsel %vm1650_vm5, %v689_v13, 0.0 }
 0x183   :  { %v676_v28 = vadd.f32 %v674_v21, %v650_v3  ;;  %v733_v56 = vsel %vm279_vm6, %v730_v63, %v732_v1  ;;  %v734_v39 = vsel %vm279_vm6, %v732_v1, %v730_v63  ;;  %v3079_v22 = vstv %s2099_s27  ;;  %s2780_s27 = sld [smem:[#allocation8 + $0x5]] }
 0x184   :  { %v695_v27 = vmul.f32 %v3079_v22, %v691_v44  ;;  %v3080_v11 = vmov %v3079_v22  ;;  %v3081_v58 = vstv %s2110_s1  ;;  %v3083_v9 = vstv %s2112_s16  ;;  %s3098_s16 = sld [smem:[#allocation24_spill]] }
 0x185   :  { %v696_v25 = vmul.f32 %v3080_v11, %v692_v16  ;;  %v701_v26 = vmul.f32 %v3081_v58, %v691_v44  ;;  %v3082_v60 = vmov %v3081_v58  ;;  %v707_v29 = vmul.f32 %v3083_v9, %v691_v44  ;;  %s2784_s1 = sld [smem:[#allocation8 + $0x9]] }
 0x186   :  { %v702_v33 = vmul.f32 %v3082_v60, %v692_v16  ;;  %v3084_v19 = vmov %v3083_v9  ;;  %v735_v42 = vsel %vm1922_vm9, %v733_v56, 0.0  ;;  %v736_v35 = vsel %vm1676_vm7, %v734_v39, 0.0  ;;  %v836_v9 = vpop.permute.xlu1 %835 }
 0x187   :  { %v708_v46 = vmul.f32 %v3084_v19, %v692_v16  ;;  %v697_v1 = vadd.f32 %v695_v27, %v663_v18  ;;  %v698_v61 = vadd.f32 %v696_v25, %v664_v43  ;;  %v703_v31 = vadd.f32 %v701_v26, %v669_v8 }
 0x188   :  { %v704_v50 = vadd.f32 %v702_v33, %v670_v15  ;;  %v709_v36 = vadd.f32 %v707_v29, %v675_v49  ;;  %v3086_v20 = vstv %s2118_s12  ;;  %v3094_v47 = vstv %s3085_s17  ;;  %v834_v33 = vpop.permute.xlu0 %833  ;;  %s3105_s12 = sld [smem:[#allocation62_spill]] }
 0x189   :  { %v710_v41 = vadd.f32 %v708_v46, %v676_v28  ;;  %v739_v53 = vmul.f32 %v3086_v20, %v735_v42  ;;  %v3087_v10 = vmov %v3086_v20  ;;  %v715_v24 = vadd.f32 %v3088_v23, %v697_v1 }
 0x18a   :  { %v740_v37 = vmul.f32 %v3087_v10, %v736_v35  ;;  %v716_v48 = vadd.f32 %v3089_v6, %v698_v61  ;;  %v721_v3 = vadd.f32 %v3090_v34, %v703_v31  ;;  %v722_v45 = vadd.f32 %v3091_v40, %v704_v50 }
 0x18b   :  { %v727_v4 = vadd.f32 %v3092_v2, %v709_v36  ;;  %v728_v5 = vadd.f32 %v3093_v12, %v710_v41  ;;  %v745_v51 = vmul.f32 %v3094_v47, %v735_v42  ;;  %v3095_v52 = vmov %v3094_v47 }
 0x18c   :  { %v746_v54 = vmul.f32 %v3095_v52, %v736_v35  ;;  %v741_v59 = vadd.f32 %v739_v53, %v715_v24  ;;  %v742_v21 = vadd.f32 %v740_v37, %v716_v48  ;;  %v3096_v63 = vstv %s2162_s29  ;;  %v3106_v53 = vld [vmem:[#allocation70_spill] sm:$0xff]  ;;  %v3107_v37 = vld [vmem:[#allocation72_spill] sm:$0xff]  ;;  %v3109_v24 = vld [vmem:[#allocation73_spill] sm:$0xff]  ;;  %s2786_s29 = sld [smem:[#allocation8 + $0xa]] }
 0x18d   :  { %v751_v18 = vmul.f32 %v3096_v63, %v735_v42  ;;  %v3097_v43 = vmov %v3096_v63  ;;  %v747_v17 = vadd.f32 %v745_v51, %v721_v3  ;;  %v759_v15 = vsel %vm234_vm4, %v2510_v32, %v758_v14  ;;  %v3110_v48 = vld [vmem:[#allocation74_spill] sm:$0xff]  ;;  %v3111_v3 = vld [vmem:[#allocation75_spill] sm:$0xff] }
 0x18e   :  { %v752_v13 = vmul.f32 %v3097_v43, %v736_v35  ;;  %v748_v8 = vadd.f32 %v746_v54, %v722_v45  ;;  %v760_v49 = vsel %vm234_vm4, %v758_v14, %v2510_v32  ;;  %v762_v56 = vsel %vm1650_vm5, %v759_v15, 0.0  ;;  %v880_v43 = vpop.permute.xlu1 %879 }
 0x18f   :  { %v753_v28 = vadd.f32 %v751_v18, %v727_v4  ;;  %v761_v16 = vsel %vm1895_vm8, %v760_v49, 0.0  ;;  %v3099_v39 = vstv %s2164_s30  ;;  %v3101_v25 = vstv %s2177_s5  ;;  %v878_v18 = vpop.permute.xlu0 %877  ;;  %s2791_s30 = sld [smem:[#allocation8 + $0xb]]  ;;  %s2793_s5 = sld [smem:[#allocation8 + $0xf]] }
 0x190   :  { %v754_v44 = vadd.f32 %v752_v13, %v728_v5  ;;  %v765_v22 = vmul.f32 %v3099_v39, %v761_v16  ;;  %v3100_v27 = vmov %v3099_v39  ;;  %v771_v58 = vmul.f32 %v3101_v25, %v761_v16 }
 0x191   :  { %v766_v11 = vmul.f32 %v3100_v27, %v762_v56  ;;  %v3102_v26 = vmov %v3101_v25  ;;  %v3103_v29 = vstv %s3098_s16  ;;  %v803_v46 = vsel %vm279_vm6, %v800_v0, %v802_v30 }
 0x192   :  { %v772_v60 = vmul.f32 %v3102_v26, %v762_v56  ;;  %v777_v32 = vmul.f32 %v3103_v29, %v761_v16  ;;  %v3104_v14 = vmov %v3103_v29  ;;  %v804_v42 = vsel %vm279_vm6, %v802_v30, %v800_v0  ;;  %v3108_v30 = vld [vmem:[#allocation71_spill] sm:$0xff] }
 0x193   :  { %v778_v19 = vmul.f32 %v3104_v14, %v762_v56  ;;  %v767_v35 = vadd.f32 %v765_v22, %v741_v59  ;;  %v768_v1 = vadd.f32 %v766_v11, %v742_v21  ;;  %v773_v61 = vadd.f32 %v771_v58, %v747_v17 }
 0x194   :  { %v774_v31 = vadd.f32 %v772_v60, %v748_v8  ;;  %v779_v50 = vadd.f32 %v777_v32, %v753_v28  ;;  %v805_v41 = vsel %vm1922_vm9, %v803_v46, 0.0  ;;  %v806_v20 = vsel %vm1676_vm7, %v804_v42, 0.0 }
 0x195   :  { %v780_v36 = vadd.f32 %v778_v19, %v754_v44  ;;  %v785_v10 = vadd.f32 %v3106_v53, %v767_v35  ;;  %v791_v0 = vadd.f32 %v3107_v37, %v773_v61  ;;  %v786_v23 = vadd.f32 %v3108_v30, %v768_v1  ;;  %v3127_v53 = vld [vmem:[#allocation56_spill] sm:$0xff]  ;;  %v3130_v30 = vld [vmem:[#allocation59_spill] sm:$0xff] }
 0x196   :  { %v792_v6 = vadd.f32 %v3109_v24, %v774_v31  ;;  %v797_v34 = vadd.f32 %v3110_v48, %v779_v50  ;;  %v3112_v45 = vstv %s2194_s9  ;;  %v3114_v5 = vstv %s2202_s0  ;;  %v3131_v24 = vld [vmem:[#allocation60_spill] sm:$0xff]  ;;  %v3132_v48 = vld [vmem:[#allocation61_spill] sm:$0xff]  ;;  %s2736_s9 = sld [smem:[#allocation8]] }
 0x197   :  { %v798_v40 = vadd.f32 %v3111_v3, %v780_v36  ;;  %v809_v2 = vmul.f32 %v3112_v45, %v805_v41  ;;  %v3113_v4 = vmov %v3112_v45  ;;  %v815_v47 = vmul.f32 %v3114_v5, %v805_v41  ;;  %s2797_s0 = sld [smem:[#allocation8 + $0x10]] }
 0x198   :  { %v810_v12 = vmul.f32 %v3113_v4, %v806_v20  ;;  %v3115_v51 = vmov %v3114_v5  ;;  %v3116_v54 = vstv %s3105_s12  ;;  %v837_v8 = vsel %vm234_vm4, %v834_v33, %v836_v9 }
 0x199   :  { %v816_v52 = vmul.f32 %v3115_v51, %v806_v20  ;;  %v821_v59 = vmul.f32 %v3116_v54, %v805_v41  ;;  %v3117_v21 = vmov %v3116_v54  ;;  %v811_v13 = vadd.f32 %v809_v2, %v785_v10  ;;  %v3128_v10 = vld [vmem:[#allocation57_spill] sm:$0xff] }
 0x19a   :  { %v822_v63 = vmul.f32 %v3117_v21, %v806_v20  ;;  %v812_v17 = vadd.f32 %v810_v12, %v786_v23  ;;  %v838_v15 = vsel %vm234_vm4, %v836_v9, %v834_v33  ;;  %v817_v49 = vadd.f32 %v815_v47, %v791_v0 }
 0x19b   :  { %v818_v28 = vadd.f32 %v816_v52, %v792_v6  ;;  %v823_v44 = vadd.f32 %v821_v59, %v797_v34  ;;  %v839_v56 = vsel %vm1895_vm8, %v838_v15, 0.0  ;;  %v840_v39 = vsel %vm1650_vm5, %v837_v8, 0.0 }
 0x19c   :  { %v824_v16 = vadd.f32 %v822_v63, %v798_v40  ;;  %v881_v22 = vsel %vm279_vm6, %v878_v18, %v880_v43  ;;  %v882_v27 = vsel %vm279_vm6, %v880_v43, %v878_v18  ;;  %v3119_v11 = vstv %s2226_s21  ;;  %s2799_s21 = sld [smem:[#allocation8 + $0x11]] }
 0x19d   :  { %v843_v25 = vmul.f32 %v3119_v11, %v839_v56  ;;  %v3120_v58 = vmov %v3119_v11  ;;  %v3121_v60 = vstv %s3118_s13  ;;  %v3123_v29 = vstv %s2240_s24  ;;  %v3138_v11 = vld [vmem:[#allocation20_spill] sm:$0xff]  ;;  %s2771_s24 = sld [smem:[#allocation8 + $0xe]] }
 0x19e   :  { %v844_v26 = vmul.f32 %v3120_v58, %v840_v39  ;;  %v849_v33 = vmul.f32 %v3121_v60, %v839_v56  ;;  %v3122_v9 = vmov %v3121_v60  ;;  %v855_v32 = vmul.f32 %v3123_v29, %v839_v56 }
 0x19f   :  { %v850_v38 = vmul.f32 %v3122_v9, %v840_v39  ;;  %v3124_v55 = vmov %v3123_v29  ;;  %v883_v19 = vsel %vm1922_vm9, %v881_v22, 0.0  ;;  %v884_v7 = vsel %vm1676_vm7, %v882_v27, 0.0  ;;  %v3137_v22 = vld [vmem:[#allocation17_spill] sm:$0xff]  ;;  %v3139_v29 = vld [vmem:[#allocation18_spill] sm:$0xff] }
 0x1a0   :  { %v856_v14 = vmul.f32 %v3124_v55, %v840_v39  ;;  %v845_v46 = vadd.f32 %v843_v25, %v811_v13  ;;  %v846_v42 = vadd.f32 %v844_v26, %v812_v17  ;;  %v851_v35 = vadd.f32 %v849_v33, %v817_v49 }
 0x1a1   :  { %v852_v1 = vadd.f32 %v850_v38, %v818_v28  ;;  %v857_v61 = vadd.f32 %v855_v32, %v823_v44  ;;  %v3125_v50 = vstv %s2242_s19  ;;  %v3133_v3 = vstv %s2262_s7  ;;  %s2745_s19 = sld [smem:[#allocation8 + $0x6]]  ;;  %s1386_s7 = smov [#allocation11]  }
 0x1a2   :  { %v858_v31 = vadd.f32 %v856_v14, %v824_v16  ;;  %v887_v36 = vmul.f32 %v3125_v50, %v883_v19  ;;  %v3126_v41 = vmov %v3125_v50  ;;  %v863_v57 = vadd.f32 %v3127_v53, %v845_v46  ;;  %s1096_s28 = sshll.u32 %s1386_s7, 4  ;;  %s1097_s28 = int_to_ptr.vmem [resolvable:$true] %s1096_s28 }
 0x1a3   :  { %v888_v20 = vmul.f32 %v3126_v41, %v884_v7  ;;  %v869_v37 = vadd.f32 %v3128_v10, %v851_v35  ;;  %v864_v0 = vadd.f32 %v3129_v62, %v846_v42  ;;  %v870_v23 = vadd.f32 %v3130_v30, %v852_v1  ;;  %v3141_v1 = vld [vmem:[#allocation22_spill] sm:$0xff]  ;;  %s1345_s8 = scalar_lea.vmem %s1097_s28, 768  ;;  %p1350_p8 = scmp.lt.s32.totalorder %s1097_s28, %s1097_s28 }
 0x1a4   :  { %v875_v6 = vadd.f32 %v3131_v24, %v857_v61  ;;  %v876_v34 = vadd.f32 %v3132_v48, %v858_v31  ;;  %v893_v40 = vmul.f32 %v3133_v3, %v883_v19  ;;  %v3134_v45 = vmov %v3133_v3  ;;  %v3142_v24 = vld [vmem:[#allocation21_spill] sm:$0xff]  ;;  %p1346_p7 = scmp.ne.s32.totalorder %s1097_s28, %s1345_s8  ;;  %p1351_p9 = scmp.lt.s32.totalorder %s1345_s8, %s1345_s8 }
 0x1a5   :  { %v894_v2 = vmul.f32 %v3134_v45, %v884_v7  ;;  %v2712_v4 = vadd.f32 %v887_v36, %v863_v57  ;;  %v2714_v12 = vadd.f32 %v888_v20, %v864_v0  ;;  %v3135_v5 = vstv %s2264_s11  ;;  %s2738_s11 = sld [smem:[#allocation8 + $0x1]] }
 0x1a6   :  { %v899_v47 = vmul.f32 %v3135_v5, %v883_v19  ;;  %v3136_v51 = vmov %v3135_v5  ;;  %v2720_v54 = vadd.f32 %v893_v40, %v869_v37  ;;  %v3140_v19 = vld [vmem:[#allocation19_spill] sm:$0xff]  ;;  %v976_v0 = vstv %s2736_s9  ;;  %p1352_p10 = por %p1351_p9, %p1350_p8 }
 0x1a7   :  { %v900_v52 = vmul.f32 %v3136_v51, %v884_v7  ;;  %v2722_v59 = vadd.f32 %v894_v2, %v870_v23  ;;  %v903_v18 = vmin.f32 %v2712_v4, 20.0  ;;  %v904_v43 = vmin.f32 %v2714_v12, 20.0 }
 0x1a8   :  { %v2724_v21 = vadd.f32 %v899_v47, %v875_v6  ;;  %v923_v13 = vmin.f32 %v2720_v54, 20.0  ;;  %v986_v40 = vstv %s2743_s15  ;;  %v1014_v45 = vstv %s2745_s19  ;;  %p1353_p11 = pnand %p1352_p10, %p1346_p7 }
 0x1a9   :  { %v2726_v63 = vadd.f32 %v900_v52, %v876_v34  ;;  %v924_v17 = vmin.f32 %v2722_v59, 20.0  ;;  %v905_v8 = vmul.f32 1.442695, %v903_v18  ;;  %v907_v15 = vmul.f32 1.442695, %v904_v43 }
 0x1aa   :  { %v943_v49 = vmin.f32 %v2724_v21, 20.0  ;;  %v925_v44 = vmul.f32 1.442695, %v923_v13  ;;  %v1018_v5 = vstv %s2747_s22 }
 0x1ab   :  { %v944_v28 = vmin.f32 %v2726_v63, 20.0  ;;  %v927_v16 = vmul.f32 1.442695, %v924_v17  ;;  %1241 = vpow2.f32 %v905_v8  ;;  %v980_v30 = vstv %s2738_s11 }
 0x1ac   :  { %v945_v56 = vmul.f32 1.442695, %v943_v49  ;;  %1243 = vpow2.f32 %v907_v15 }
 0x1ad   :  { %v947_v39 = vmul.f32 1.442695, %v944_v28  ;;  %1245 = vpow2.f32 %v925_v44 }
 0x1ae   :  { %1247 = vpow2.f32 %v927_v16 }
 0x1af   :  { %1249 = vpow2.f32 %v945_v56 }
 0x1b0   :  { %1251 = vpow2.f32 %v947_v39 }
 0x1b1   :  { %1253 = vtanh.f32 %v3137_v22 }
 0x1b2   :  { %1255 = vtanh.f32 %v3138_v11 }
 0x1b3   :  { %1257 = vtanh.f32 %v3139_v29 }
 0x1b4   :  { %1259 = vtanh.f32 %v3140_v19 }
 0x1b5   :  { %v1242_v27 = vpop.eup %1241  ;;  %1261 = vtanh.f32 %v3141_v1 }
 0x1b6   :  { %v1244_v25 = vpop.eup %1243  ;;  %v909_v58 = vadd.f32 1.0, %v1242_v27 }
 0x1b7   :  { %v1246_v26 = vpop.eup %1245  ;;  %v910_v60 = vadd.f32 1.0, %v1244_v25 }
 0x1b8   :  { %v1248_v33 = vpop.eup %1247  ;;  %v911_v9 = vmul.f32 %v909_v58, %v909_v58  ;;  %v929_v38 = vadd.f32 1.0, %v1246_v26 }
 0x1b9   :  { %v1250_v32 = vpop.eup %1249  ;;  %v912_v55 = vmul.f32 %v910_v60, %v910_v60  ;;  %v930_v14 = vadd.f32 1.0, %v1248_v33 }
 0x1ba   :  { %v1252_v7 = vpop.eup %1251  ;;  %v915_v46 = vadd.f32 1.0, %v911_v9  ;;  %v931_v42 = vmul.f32 %v929_v38, %v929_v38  ;;  %v949_v35 = vadd.f32 1.0, %v1250_v32  ;;  %v1208_v2 = vadd.f32 -1.0, %v911_v9 }
 0x1bb   :  { %v916_v61 = vadd.f32 1.0, %v912_v55  ;;  %v932_v31 = vmul.f32 %v930_v14, %v930_v14  ;;  %v950_v50 = vadd.f32 1.0, %v1252_v7  ;;  %v2749_v57 = vpop.eup %1253  ;;  %v1209_v51 = vadd.f32 -1.0, %v912_v55 }
 0x1bc   :  { %1263 = vrcp.f32 %v915_v46  ;;  %v935_v36 = vadd.f32 1.0, %v931_v42  ;;  %v951_v41 = vmul.f32 %v949_v35, %v949_v35  ;;  %v2751_v37 = vpop.eup %1255  ;;  %v977_v6 = vmul.f32 %v2749_v57, %v976_v0 }
 0x1bd   :  { %1265 = vrcp.f32 %v916_v61  ;;  %v936_v20 = vadd.f32 1.0, %v932_v31  ;;  %v952_v53 = vmul.f32 %v950_v50, %v950_v50  ;;  %v1258_v23 = vpop.eup %1257  ;;  %v981_v48 = vmul.f32 %v2751_v37, %v980_v30 }
 0x1be   :  { %1267 = vrcp.f32 %v935_v36  ;;  %v955_v10 = vadd.f32 1.0, %v951_v41  ;;  %v1260_v34 = vpop.eup %1259  ;;  %v978_v52 = vmul.f32 %v1258_v23, %v976_v0  ;;  %v1210_v8 = vadd.f32 -1.0, %v931_v42 }
 0x1bf   :  { %1269 = vrcp.f32 %v936_v20  ;;  %v956_v62 = vadd.f32 1.0, %v952_v53  ;;  %v2762_v3 = vpop.eup %1261  ;;  %v982_v18 = vmul.f32 %v1260_v34, %v980_v30  ;;  %v983_v43 = vadd.f32 %v981_v48, %v977_v6 }
 0x1c0   :  { %1271 = vrcp.f32 %v955_v10  ;;  %v987_v15 = vmul.f32 %v2762_v3, %v986_v40  ;;  %v1015_v49 = vmul.f32 %v2749_v57, %v1014_v45  ;;  %v1211_v16 = vadd.f32 -1.0, %v932_v31 }
 0x1c1   :  { %1273 = vrcp.f32 %v956_v62  ;;  %v1016_v56 = vmul.f32 %v1258_v23, %v1014_v45  ;;  %v1019_v39 = vmul.f32 %v2751_v37, %v1018_v5  ;;  %v1212_v26 = vadd.f32 -1.0, %v951_v41 }
 0x1c2   :  { %1275 = vtanh.f32 %v3142_v24  ;;  %v1020_v60 = vmul.f32 %v1260_v34, %v1018_v5  ;;  %v1213_v32 = vadd.f32 -1.0, %v952_v53  ;;  %v1053_v55 = vstv %s2758_s23 }
 0x1c3   :  { %v1057_v46 = vstv %s2760_s14  ;;  %v1024_v61 = vstv %s2766_s3  ;;  %v1054_v31 = vmul.f32 %v2749_v57, %v1053_v55  ;;  %v1055_v50 = vmul.f32 %v1258_v23, %v1053_v55 }
 0x1c4   :  { %v1058_v36 = vmul.f32 %v2751_v37, %v1057_v46  ;;  %v1059_v41 = vmul.f32 %v1260_v34, %v1057_v46  ;;  %v984_v20 = vadd.f32 %v982_v18, %v978_v52  ;;  %v1063_v53 = vstv %s2771_s24 }
 0x1c5   :  { %v1021_v57 = vadd.f32 %v1019_v39, %v1015_v49  ;;  %v1025_v10 = vmul.f32 %v2762_v3, %v1024_v61  ;;  %v989_v62 = vadd.f32 %v987_v15, %v983_v43  ;;  %v1064_v23 = vmul.f32 %v2762_v3, %v1063_v53 }
 0x1c6   :  { %v1264_v47 = vpop.eup %1263  ;;  %v1060_v37 = vadd.f32 %v1058_v36, %v1054_v31  ;;  %v1061_v30 = vadd.f32 %v1059_v41, %v1055_v50  ;;  %v992_v34 = vstv %s2775_s25  ;;  %v1030_v45 = vstv %s2784_s1 }
 0x1c7   :  { %v1266_v13 = vpop.eup %1265  ;;  %v918_v17 = vmul.f32 %v1264_v47, %v1208_v2  ;;  %v1004_v2 = vstv %s2780_s27  ;;  %v1027_v5 = vadd.f32 %v1025_v10, %v1021_v57  ;;  %v1036_v47 = vstv %s2786_s29 }
 0x1c8   :  { %v1268_v28 = vpop.eup %1267  ;;  %v920_v44 = vmul.f32 %v1266_v13, %v1209_v51  ;;  %v1069_v51 = vstv %s2793_s5  ;;  %v1042_v43 = vstv %s2791_s30  ;;  %v1075_v13 = vstv %s2797_s0 }
 0x1c9   :  { %v1270_v27 = vpop.eup %1269  ;;  %v921_v25 = vmul.f32 %v918_v17, %v2712_v4  ;;  %v938_v58 = vmul.f32 %v1268_v28, %v1210_v8  ;;  %v1081_v17 = vstv %s2799_s21  ;;  %v1066_v28 = vadd.f32 %v1064_v23, %v1060_v37 }
 0x1ca   :  { %v1272_v33 = vpop.eup %1271  ;;  %v922_v9 = vmul.f32 %v920_v44, %v2714_v12  ;;  %v940_v38 = vmul.f32 %v1270_v27, %v1211_v16 }
 0x1cb   :  { %v1274_v14 = vpop.eup %1273  ;;  %v941_v4 = vmul.f32 %v938_v58, %v2720_v54  ;;  %v958_v7 = vmul.f32 %v1272_v33, %v1212_v26  ;;  %1277 = vtanh.f32 %v921_v25 }
 0x1cc   :  { %v1276_v42 = vpop.eup %1275  ;;  %v942_v12 = vmul.f32 %v940_v38, %v2722_v59  ;;  %v960_v35 = vmul.f32 %v1274_v14, %v1213_v32  ;;  %1279 = vtanh.f32 %v922_v9 }
 0x1cd   :  { %v961_v54 = vmul.f32 %v958_v7, %v2724_v21  ;;  %1281 = vtanh.f32 %v941_v4  ;;  %v988_v21 = vmul.f32 %v1276_v42, %v986_v40  ;;  %v1026_v0 = vmul.f32 %v1276_v42, %v1024_v61 }
 0x1ce   :  { %v962_v59 = vmul.f32 %v960_v35, %v2726_v63  ;;  %1283 = vtanh.f32 %v942_v12  ;;  %v1022_v63 = vadd.f32 %v1020_v60, %v1016_v56  ;;  %v1065_v6 = vmul.f32 %v1276_v42, %v1063_v53 }
 0x1cf   :  { %1285 = vtanh.f32 %v961_v54  ;;  %v990_v48 = vadd.f32 %v988_v21, %v984_v20  ;;  %v998_v40 = vstv %s2778_s26 }
 0x1d0   :  { %1287 = vtanh.f32 %v962_v59  ;;  %v1028_v18 = vadd.f32 %v1026_v0, %v1022_v63  ;;  %v1067_v44 = vadd.f32 %v1065_v6, %v1061_v30 }
 0x1d5   :  { %v1278_v52 = vpop.eup %1277 }
 0x1d6   :  { %v1280_v8 = vpop.eup %1279  ;;  %v993_v15 = vmul.f32 %v1278_v52, %v992_v34  ;;  %v1031_v49 = vmul.f32 %v1278_v52, %v1030_v45  ;;  %v1070_v39 = vmul.f32 %v1278_v52, %v1069_v51 }
 0x1d7   :  { %v1282_v3 = vpop.eup %1281  ;;  %v994_v16 = vmul.f32 %v1280_v8, %v992_v34  ;;  %v1032_v56 = vmul.f32 %v1280_v8, %v1030_v45  ;;  %v1071_v27 = vmul.f32 %v1280_v8, %v1069_v51 }
 0x1d8   :  { %v1284_v25 = vpop.eup %1283  ;;  %v995_v58 = vadd.f32 %v993_v15, %v989_v62  ;;  %v999_v26 = vmul.f32 %v1282_v3, %v998_v40  ;;  %v1033_v60 = vadd.f32 %v1031_v49, %v1027_v5  ;;  %v1037_v33 = vmul.f32 %v1282_v3, %v1036_v47 }
 0x1d9   :  { %v1286_v9 = vpop.eup %1285  ;;  %v996_v38 = vadd.f32 %v994_v16, %v990_v48  ;;  %v1000_v32 = vmul.f32 %v1284_v25, %v998_v40  ;;  %v1034_v55 = vadd.f32 %v1032_v56, %v1028_v18  ;;  %v1038_v14 = vmul.f32 %v1284_v25, %v1036_v47 }
 0x1da   :  { %v1288_v4 = vpop.eup %1287  ;;  %v1001_v7 = vadd.f32 %v999_v26, %v995_v58  ;;  %v1005_v46 = vmul.f32 %v1286_v9, %v1004_v2  ;;  %v1039_v42 = vadd.f32 %v1037_v33, %v1033_v60  ;;  %v1043_v12 = vmul.f32 %v1286_v9, %v1042_v43 }
 0x1db   :  { %v1002_v35 = vadd.f32 %v1000_v32, %v996_v38  ;;  %v1006_v61 = vmul.f32 %v1288_v4, %v1004_v2  ;;  %v1040_v54 = vadd.f32 %v1038_v14, %v1034_v55  ;;  %v1044_v31 = vmul.f32 %v1288_v4, %v1042_v43 }
 0x1dc   :  { %v1007_v50 = vadd.f32 %v1005_v46, %v1001_v7  ;;  %v1045_v59 = vadd.f32 %v1043_v12, %v1039_v42  ;;  %v1072_v36 = vadd.f32 %v1070_v39, %v1066_v28  ;;  %v1073_v41 = vadd.f32 %v1071_v27, %v1067_v44 }
 0x1dd   :  { %v1008_v20 = vadd.f32 %v1006_v61, %v1002_v35  ;;  %v1046_v21 = vadd.f32 %v1044_v31, %v1040_v54  ;;  %v1076_v53 = vmul.f32 %v1282_v3, %v1075_v13  ;;  %v1077_v57 = vmul.f32 %v1284_v25, %v1075_v13 }
 0x1de   :  { %v1009_v10 = vmul.f32 %v1007_v50, %v3137_v22  ;;  %v1047_v62 = vmul.f32 %v1045_v59, %v3138_v11  ;;  %v1082_v63 = vmul.f32 %v1286_v9, %v1081_v17  ;;  %v1083_v0 = vmul.f32 %v1288_v4, %v1081_v17 }
 0x1df   :  { %v1010_v37 = vmul.f32 %v1008_v20, %v3139_v29  ;;  %v1048_v30 = vmul.f32 %v1046_v21, %v3140_v19  ;;  %v1078_v23 = vadd.f32 %v1076_v53, %v1072_v36  ;;  %v1079_v6 = vadd.f32 %v1077_v57, %v1073_v41 }
 0x1e0   :  { %1011 = vst [vmem:[#allocation11] sm:$0xff] %v1009_v10  ;;  %1050 = vst [vmem:[#allocation11 + $0x10] sm:$0xff] %v1047_v62 }
 0x1e1   :  { %1012 = vst [vmem:[#allocation11 + $0x8] sm:$0xff] %v1010_v37  ;;  %1051 = vst [vmem:[#allocation11 + $0x18] sm:$0xff] %v1048_v30  ;;  %v1084_v48 = vadd.f32 %v1082_v63, %v1078_v23  ;;  %v1085_v34 = vadd.f32 %v1083_v0, %v1079_v6 }
 0x1e3   :  { %v1086_v22 = vmul.f32 %v1084_v48, %v3141_v1  ;;  %v1087_v11 = vmul.f32 %v1085_v34, %v3142_v24 }
 0x1e5   :  { %1089 = vst [vmem:[#allocation11 + $0x20] sm:$0xff] %v1086_v22  ;;  %1090 = vst [vmem:[#allocation11 + $0x28] sm:$0xff] %v1087_v11 }
 0x1e6   :  { %1356 = shalt.err (!%p1353_p11)
}
 0x1e7   :  { %s3143_s6 = sld [smem:[#allocation76_spill]] }
 0x1ed   :  { %s1357_s4 = scalar_lea.hbm %s3143_s6, 768 }
 0x1ee   :  { %p1358_p12 = scmp.ne.s32.totalorder %s3143_s6, %s1357_s4  ;;  %p1361_p13 = scmp.lt.u32.totalorder %s1357_s4, %s3143_s6 }
 0x1f0   :  { %p1363_p0 = pnand %p1361_p13, %p1358_p12 }
 0x1f2   :  { %1366 = shalt.err (!%p1363_p0)
}
 0x1f3   :  { %s3144_s12 = smov 16   ;;  %s3145_s13 = smov 256  }
 0x1f4   :  { %1102 = dma.vmem_to_hbm [thread:$0]  %s1097_s28, 768, %s3143_s6, [#allocation4], %s3145_s13, %s3145_s13, %s3144_s12  }
 0x1f5   :  { %1375 = dma.done.wait [#allocation4], 768  }
 0x1f6   :  { %1376 = vsyncadd [#allocation4], 4294966528 }
 0x1f7   :  { %1106 = vsyncpa [#allocation3], 1 }
 0x1f8   :  { %1107 = vsyncpa [#allocation4], 1 }
 0x1f9   :  { %1108 = vsyncpa [#allocation5], 1 }
 0x1fa   :  { %1109 = vsyncpa [#allocation6], 1 }
 0x1fb   :  { %1110 = vsyncpa [#allocation9], 1 }

</bundles_post_ra>
